<compile_context>
chip_gen: v7x
topology: tpu7x:2x2x1
jax: 0.10.0
libtpu: 0.0.40
codegen_flags: <defaults>
</compile_context>

<pallas_src>
import math
import numpy as np
import jax
import jax.numpy as jnp
from jax.experimental import pallas as pl
from jax.experimental.pallas import tpu as pltpu


# ---------------------------------------------------------------------------
# Kernel
# ---------------------------------------------------------------------------
def _make_attention_kernel(block_b, seq_len, hidden_ch, head_num):
    C = hidden_ch
    H = head_num
    hs = C // H
    rows = block_b * seq_len

    def kernel(x_ref, wqkv_ref, bqkv_ref, wo_ref, bo_ref, o_ref,
               q_s, k_s, v_s, ctx_s):
        h = pl.program_id(1)

        # ---- once per batch block: fused QKV projection -------------------
        @pl.when(h == 0)
        def _():
            x2 = x_ref[...].reshape(rows, C)                       # bf16 rows
            qkv = jnp.dot(x2, wqkv_ref[...],
                          preferred_element_type=jnp.float32)      # (rows, 3C) f32
            # Bias-add + bf16 cast per head slice, stored head-major so the
            # per-head grid steps use cheap leading-dim indexing; only the
            # single (rows, 3C) f32 matmul result is briefly live.
            for hh in range(H):
                lo = hh * hs
                q_s[hh] = (qkv[:, lo:lo + hs] + bqkv_ref[:, lo:lo + hs]
                           ).astype(jnp.bfloat16).reshape(block_b, seq_len, hs)
                k_s[hh] = (qkv[:, C + lo:C + lo + hs]
                           + bqkv_ref[:, C + lo:C + lo + hs]
                           ).astype(jnp.bfloat16).reshape(block_b, seq_len, hs)
                v_s[hh] = (qkv[:, 2 * C + lo:2 * C + lo + hs]
                           + bqkv_ref[:, 2 * C + lo:2 * C + lo + hs]
                           ).astype(jnp.bfloat16).reshape(block_b, seq_len, hs)

        # ---- one head per grid step (bounded live ranges) ------------------
        q_h = q_s[h]                                   # (block_b, S, hs) bf16
        k_h = k_s[h]
        v_h = v_s[h]

        # scores[b,i,j] = sum_d q[b,i,d] * k[b,j,d]   (no explicit k.T)
        s = jnp.einsum('bqd,bkd->bqk', q_h, k_h,
                       preferred_element_type=jnp.float32)   # (b, S, S) f32

        # Numerically stable softmax in f32; reciprocal on the EUP.
        m = jnp.max(s, axis=-1, keepdims=True)
        e = jnp.exp(s - m)
        denom = jnp.sum(e, axis=-1, keepdims=True)
        p = e * pl.reciprocal(denom, approx=True)

        # context[b,i,d] = sum_j p[b,i,j] * v[b,j,d]
        ctx = jnp.einsum('bqk,bkd->bqd', p.astype(jnp.bfloat16), v_h,
                         preferred_element_type=jnp.float32)
        ctx_s[h] = ctx.astype(jnp.bfloat16)

        # ---- after the last head: ONE K=C output projection ----------------
        @pl.when(h == H - 1)
        def _():
            c2 = jnp.concatenate(
                [ctx_s[hh].reshape(rows, hs) for hh in range(H)], axis=-1)
            out = jnp.dot(c2, wo_ref[...], preferred_element_type=jnp.float32)
            out = out + bo_ref[...]
            o_ref[...] = out.reshape(block_b, seq_len, C).astype(o_ref.dtype)

    return kernel


# ---------------------------------------------------------------------------
# VMEM budgeting / block-size selection
# ---------------------------------------------------------------------------
def _vmem_budget_bytes():
    try:
        cap = pltpu.get_tpu_info().vmem_capacity_bytes
    except Exception:
        cap = 64 * 1024 * 1024        # conservative fallback (v7x-sized)
    return int(0.75 * cap)            # ~96 MiB on v5e/v6e, ~48 MiB on v7x


def _vmem_bytes_estimate(block_b, S, C, H):
    rows = block_b * S
    bf, f32 = 2, 4
    x_io = 2 * block_b * S * C * bf              # x bf16, double-buffered
    o_io = 2 * block_b * S * C * f32             # out f32, double-buffered
    weights = C * 3 * C * bf + 3 * C * f32 + C * C * bf + C * f32   # single-buffered
    scratch = 4 * block_b * S * C * bf           # q, k, v, ctx head-major scratch
    qkv_f32 = rows * 3 * C * f32                 # h==0 matmul result
    scores = 3 * block_b * S * S * f32           # s / exp / probs
    outproj = 2 * rows * C * f32
    return x_io + o_io + weights + scratch + qkv_f32 + scores + outproj


def _pick_block_b(B, S, C, H, vmem_budget, target_rows=512):
    """Largest batch block that (a) fits the VMEM budget, (b) leaves >= 2 grid
    steps on the parallel axis (v7x has 2 TensorCores), (c) reaches target_rows
    so the 256-deep MXUs on v6e/v7x are fed."""
    divisors = [d for d in range(1, B + 1) if B % d == 0]
    fits = [d for d in divisors if _vmem_bytes_estimate(d, S, C, H) <= vmem_budget]
    if not fits:
        fits = [divisors[0]]
    multi = [d for d in fits if B // d >= 2]
    cand = multi if multi else fits
    for d in cand:
        if d * S >= target_rows:
            return d
    return cand[-1]


# ---------------------------------------------------------------------------
# pallas_call wrapper
# ---------------------------------------------------------------------------
def _attention_call(x_bf16, wqkv, bqkv, wo, bo, out_dtype, block_b, head_num,
                    vmem_budget, single_buffer_weights):
    B, S, C = x_bf16.shape
    hs = C // head_num
    kernel = _make_attention_kernel(block_b, S, C, head_num)

    def const_spec(shape):
        # Grid-invariant weights: single-buffer (no useless second VMEM copy).
        if single_buffer_weights:
            return pl.BlockSpec(shape, lambda b, h: (0, 0),
                                pipeline_mode=pl.Buffered(1))
        return pl.BlockSpec(shape, lambda b, h: (0, 0))

    flops = 8 * B * S * C * C + 4 * B * S * S * C
    transcendentals = B * head_num * S * S
    bytes_accessed = (B * S * C * 2 + B * S * C * 4            # x bf16 in, out f32
                      + C * 3 * C * 2 + C * C * 2              # bf16 weights
                      + 3 * C * 4 + C * 4)                     # f32 biases

    return pl.pallas_call(
        kernel,
        out_shape=jax.ShapeDtypeStruct((B, S, C), out_dtype),
        grid_spec=pltpu.PrefetchScalarGridSpec(
            num_scalar_prefetch=0,
            grid=(B // block_b, head_num),
            in_specs=[
                pl.BlockSpec((block_b, S, C), lambda b, h: (b, 0, 0)),  # x (bf16)
                const_spec((C, 3 * C)),                                 # wqkv
                const_spec((1, 3 * C)),                                 # bqkv
                const_spec((C, C)),                                     # wo
                const_spec((1, C)),                                     # bo
            ],
            out_specs=pl.BlockSpec((block_b, S, C), lambda b, h: (b, 0, 0)),
            scratch_shapes=[
                pltpu.VMEM((head_num, block_b, S, hs), jnp.bfloat16),   # q (head-major)
                pltpu.VMEM((head_num, block_b, S, hs), jnp.bfloat16),   # k
                pltpu.VMEM((head_num, block_b, S, hs), jnp.bfloat16),   # v
                pltpu.VMEM((head_num, block_b, S, hs), jnp.bfloat16),   # ctx
            ]),
        compiler_params=pltpu.CompilerParams(
            dimension_semantics=("parallel", "arbitrary"),
            vmem_limit_bytes=int(vmem_budget)),
        cost_estimate=pl.CostEstimate(
            flops=flops, transcendentals=transcendentals,
            bytes_accessed=bytes_accessed),
    )(x_bf16, wqkv, bqkv, wo, bo)


def attention_block(x, params, head_num, block_b=None, target_rows=512):
    """x: (B, S, C) float32. params: dict of f32 weights (in,out) / biases (1,out)."""
    B, S, C = x.shape
    assert C % head_num == 0, "hidden_ch must be divisible by head_num"
    hs = C // head_num
    scale = 1.0 / math.sqrt(hs)
    # TODO(synk): production TransUNet shapes should keep C a multiple of 128
    # (and hs >= sublane quantum); the toy test below exercises padded layouts.

    # Host-side one-time weight transform: fuse Q|K|V and fold the 1/sqrt(hs)
    # scale into the Q columns (and Q bias). Matmul weights bf16, biases f32.
    wqkv = jnp.concatenate([params["wq"] * scale, params["wk"], params["wv"]],
                           axis=1).astype(jnp.bfloat16)
    bqkv = jnp.concatenate([params["bq"] * scale, params["bk"], params["bv"]],
                           axis=1).astype(jnp.float32)
    wo = params["wo"].astype(jnp.bfloat16)
    bo = params["bo"].astype(jnp.float32)

    vmem_budget = _vmem_budget_bytes()
    if block_b is None:
        block_b = _pick_block_b(B, S, C, head_num, vmem_budget, target_rows)
    assert B % block_b == 0

    # Matmuls run in bf16 anyway -> DMA the activations as bf16 (halves bytes).
    x_bf16 = x.astype(jnp.bfloat16)

    try:
        return _attention_call(x_bf16, wqkv, bqkv, wo, bo, x.dtype, block_b,
                               head_num, vmem_budget, single_buffer_weights=True)
    except Exception:
        # Fallback if pipeline_mode=pl.Buffered(1) is unsupported by this build.
        return _attention_call(x_bf16, wqkv, bqkv, wo, bo, x.dtype, block_b,
                               head_num, vmem_budget, single_buffer_weights=False)


# ---------------------------------------------------------------------------
# Pure-JAX reference + test
# ---------------------------------------------------------------------------
def _reference(x, params, head_num):
    """Pure-JAX (f32) reference mirroring the PyTorch forward."""
    B, S, C = x.shape
    hs = C // head_num

    def lin(t, w, b):
        return t @ w + b

    q = lin(x, params["wq"], params["bq"][0])
    k = lin(x, params["wk"], params["bk"][0])
    v = lin(x, params["wv"], params["bv"][0])

    def split(t):  # (B,S,C) -> (B,H,S,hs)
        return t.reshape(B, S, head_num, hs).transpose(0, 2, 1, 3)

    qh, kh, vh = split(q), split(k), split(v)
    scores = jnp.einsum("bhqd,bhkd->bhqk", qh, kh) / math.sqrt(hs)
    probs = jax.nn.softmax(scores, axis=-1)
    ctx = jnp.einsum("bhqk,bhkd->bhqd", probs, vh)
    ctx = ctx.transpose(0, 2, 1, 3).reshape(B, S, C)
    return lin(ctx, params["wo"], params["bo"][0])


def init_params(key, hidden_ch):
    ks = jax.random.split(key, 8)
    s = 1.0 / math.sqrt(hidden_ch)

    def w(k):
        return jax.random.uniform(k, (hidden_ch, hidden_ch), jnp.float32, -s, s)

    def b(k):
        return jax.random.uniform(k, (1, hidden_ch), jnp.float32, -s, s)

    return {
        "wq": w(ks[0]), "bq": b(ks[1]),
        "wk": w(ks[2]), "bk": b(ks[3]),
        "wv": w(ks[4]), "bv": b(ks[5]),
        "wo": w(ks[6]), "bo": b(ks[7]),
    }


if __name__ == "__main__":
    B, S, HIDDEN, HEADS = 2, 8, 32, 4

    key = jax.random.PRNGKey(0)
    kx, kp = jax.random.split(key)
    x = jax.random.normal(kx, (B, S, HIDDEN), jnp.float32)
    params = init_params(kp, HIDDEN)

    out = jax.block_until_ready(attention_block(x, params, HEADS))
    ref = jax.block_until_ready(_reference(x, params, HEADS))

    # bf16 MXU operands (f32 accumulation) + approx reciprocal -> mixed-precision tolerance.
    np.testing.assert_allclose(np.asarray(out), np.asarray(ref),
                               rtol=3e-2, atol=3e-2)
    print("KERNEL_OK")
</pallas_src>

<mosaic_0001>
module attributes {stable_mosaic.version = 11 : i64} {
  func.func @kernel(%arg0: i32, %arg1: i32, %arg2: memref<1x8x32xbf16, #tpu.memory_space<vmem>>, %arg3: memref<32x96xbf16, #tpu.memory_space<vmem>>, %arg4: memref<1x96xf32, #tpu.memory_space<vmem>>, %arg5: memref<32x32xbf16, #tpu.memory_space<vmem>>, %arg6: memref<1x32xf32, #tpu.memory_space<vmem>>, %arg7: memref<1x8x32xf32, #tpu.memory_space<vmem>>, %arg8: memref<4x1x8x8xbf16, #tpu.memory_space<vmem>>, %arg9: memref<4x1x8x8xbf16, #tpu.memory_space<vmem>>, %arg10: memref<4x1x8x8xbf16, #tpu.memory_space<vmem>>, %arg11: memref<4x1x8x8xbf16, #tpu.memory_space<vmem>>) attributes {dimension_semantics = [#tpu.dimension_semantics<parallel>, #tpu.dimension_semantics<arbitrary>], iteration_bounds = array<i64: 2, 4>, scalar_prefetch = 0 : i64, scratch_operands = 4 : i64, tpu.core_type = #tpu.core_type<tc>, window_params = [{transform_indices = @transform_0, window_bounds = array<i64: 1, 8, 32>}, {pipeline_mode = #tpu.pipeline_mode<synchronous>, transform_indices = @transform_1, window_bounds = array<i64: 32, 96>}, {pipeline_mode = #tpu.pipeline_mode<synchronous>, transform_indices = @transform_2, window_bounds = array<i64: 1, 96>}, {pipeline_mode = #tpu.pipeline_mode<synchronous>, transform_indices = @transform_3, window_bounds = array<i64: 32, 32>}, {pipeline_mode = #tpu.pipeline_mode<synchronous>, transform_indices = @transform_4, window_bounds = array<i64: 1, 32>}, {transform_indices = @transform_5, window_bounds = array<i64: 1, 8, 32>}]} {
    %c0_i32 = arith.constant 0 : i32
    %0 = arith.cmpi eq, %arg1, %c0_i32 : i32
    %1 = arith.extui %0 : i1 to i32
    %c0_i32_0 = arith.constant 0 : i32
    %2 = arith.cmpi ne, %1, %c0_i32_0 : i32
    scf.if %2 {
      %c0_16 = arith.constant 0 : index
      %c0_17 = arith.constant 0 : index
      %c0_18 = arith.constant 0 : index
      %33 = vector.load %arg2[%c0_16, %c0_17, %c0_18] : memref<1x8x32xbf16, #tpu.memory_space<vmem>>, vector<1x8x32xbf16>
      %34 = vector.shape_cast %33 : vector<1x8x32xbf16> to vector<8x32xbf16>
      %c0_19 = arith.constant 0 : index
      %c0_20 = arith.constant 0 : index
      %35 = vector.load %arg3[%c0_19, %c0_20] : memref<32x96xbf16, #tpu.memory_space<vmem>>, vector<32x96xbf16>
      %cst_21 = arith.constant dense<0.000000e+00> : vector<8x96xf32>
      %36 = tpu.matmul %34, %35, %cst_21 {dimension_numbers = #tpu.dot_dimension_numbers<[1], [0], [0], [1], [0, 0, 1, 1], [], []>} : vector<8x32xbf16>, vector<32x96xbf16>, vector<8x96xf32> -> vector<8x96xf32>
      %37 = vector.extract_strided_slice %36 {offsets = [0, 0], sizes = [8, 8], strides = [1, 1]} : vector<8x96xf32> to vector<8x8xf32>
      %c0_22 = arith.constant 0 : index
      %c0_23 = arith.constant 0 : index
      %38 = vector.load %arg4[%c0_22, %c0_23] : memref<1x96xf32, #tpu.memory_space<vmem>>, vector<1x8xf32>
      %39 = vector.broadcast %38 : vector<1x8xf32> to vector<8x8xf32>
      %40 = arith.addf %37, %39 : vector<8x8xf32>
      %41 = arith.truncf %40 : vector<8x8xf32> to vector<8x8xbf16>
      %42 = vector.shape_cast %41 : vector<8x8xbf16> to vector<1x8x8xbf16>
      %c0_24 = arith.constant 0 : index
      %c0_25 = arith.constant 0 : index
      %c0_26 = arith.constant 0 : index
      %c0_27 = arith.constant 0 : index
      %43 = vector.load %arg8[%c0_24, %c0_25, %c0_26, %c0_27] : memref<4x1x8x8xbf16, #tpu.memory_space<vmem>>, vector<1x1x8x8xbf16>
      %44 = vector.shape_cast %43 : vector<1x1x8x8xbf16> to vector<1x8x8xbf16>
      %45 = vector.shape_cast %42 : vector<1x8x8xbf16> to vector<1x1x8x8xbf16>
      tpu.vector_store %arg8[%c0_24, %c0_25, %c0_26, %c0_27], %45 {strides = array<i32>} : memref<4x1x8x8xbf16, #tpu.memory_space<vmem>>, vector<1x1x8x8xbf16>,
      %46 = vector.extract_strided_slice %36 {offsets = [0, 32], sizes = [8, 8], strides = [1, 1]} : vector<8x96xf32> to vector<8x8xf32>
      %c0_28 = arith.constant 0 : index
      %c32 = arith.constant 32 : index
      %47 = vector.load %arg4[%c0_28, %c32] : memref<1x96xf32, #tpu.memory_space<vmem>>, vector<1x8xf32>
      %48 = vector.broadcast %47 : vector<1x8xf32> to vector<8x8xf32>
      %49 = arith.addf %46, %48 : vector<8x8xf32>
      %50 = arith.truncf %49 : vector<8x8xf32> to vector<8x8xbf16>
      %51 = vector.shape_cast %50 : vector<8x8xbf16> to vector<1x8x8xbf16>
      %c0_29 = arith.constant 0 : index
      %c0_30 = arith.constant 0 : index
      %c0_31 = arith.constant 0 : index
      %c0_32 = arith.constant 0 : index
      %52 = vector.load %arg9[%c0_29, %c0_30, %c0_31, %c0_32] : memref<4x1x8x8xbf16, #tpu.memory_space<vmem>>, vector<1x1x8x8xbf16>
      %53 = vector.shape_cast %52 : vector<1x1x8x8xbf16> to vector<1x8x8xbf16>
      %54 = vector.shape_cast %51 : vector<1x8x8xbf16> to vector<1x1x8x8xbf16>
      tpu.vector_store %arg9[%c0_29, %c0_30, %c0_31, %c0_32], %54 {strides = array<i32>} : memref<4x1x8x8xbf16, #tpu.memory_space<vmem>>, vector<1x1x8x8xbf16>,
      %55 = vector.extract_strided_slice %36 {offsets = [0, 64], sizes = [8, 8], strides = [1, 1]} : vector<8x96xf32> to vector<8x8xf32>
      %c0_33 = arith.constant 0 : index
      %c64 = arith.constant 64 : index
      %56 = vector.load %arg4[%c0_33, %c64] : memref<1x96xf32, #tpu.memory_space<vmem>>, vector<1x8xf32>
      %57 = vector.broadcast %56 : vector<1x8xf32> to vector<8x8xf32>
      %58 = arith.addf %55, %57 : vector<8x8xf32>
      %59 = arith.truncf %58 : vector<8x8xf32> to vector<8x8xbf16>
      %60 = vector.shape_cast %59 : vector<8x8xbf16> to vector<1x8x8xbf16>
      %c0_34 = arith.constant 0 : index
      %c0_35 = arith.constant 0 : index
      %c0_36 = arith.constant 0 : index
      %c0_37 = arith.constant 0 : index
      %61 = vector.load %arg10[%c0_34, %c0_35, %c0_36, %c0_37] : memref<4x1x8x8xbf16, #tpu.memory_space<vmem>>, vector<1x1x8x8xbf16>
      %62 = vector.shape_cast %61 : vector<1x1x8x8xbf16> to vector<1x8x8xbf16>
      %63 = vector.shape_cast %60 : vector<1x8x8xbf16> to vector<1x1x8x8xbf16>
      tpu.vector_store %arg10[%c0_34, %c0_35, %c0_36, %c0_37], %63 {strides = array<i32>} : memref<4x1x8x8xbf16, #tpu.memory_space<vmem>>, vector<1x1x8x8xbf16>,
      %64 = vector.extract_strided_slice %36 {offsets = [0, 8], sizes = [8, 8], strides = [1, 1]} : vector<8x96xf32> to vector<8x8xf32>
      %c0_38 = arith.constant 0 : index
      %c8 = arith.constant 8 : index
      %65 = vector.load %arg4[%c0_38, %c8] : memref<1x96xf32, #tpu.memory_space<vmem>>, vector<1x8xf32>
      %66 = vector.broadcast %65 : vector<1x8xf32> to vector<8x8xf32>
      %67 = arith.addf %64, %66 : vector<8x8xf32>
      %68 = arith.truncf %67 : vector<8x8xf32> to vector<8x8xbf16>
      %69 = vector.shape_cast %68 : vector<8x8xbf16> to vector<1x8x8xbf16>
      %c1 = arith.constant 1 : index
      %c0_39 = arith.constant 0 : index
      %c0_40 = arith.constant 0 : index
      %c0_41 = arith.constant 0 : index
      %70 = vector.load %arg8[%c1, %c0_39, %c0_40, %c0_41] : memref<4x1x8x8xbf16, #tpu.memory_space<vmem>>, vector<1x1x8x8xbf16>
      %71 = vector.shape_cast %70 : vector<1x1x8x8xbf16> to vector<1x8x8xbf16>
      %72 = vector.shape_cast %69 : vector<1x8x8xbf16> to vector<1x1x8x8xbf16>
      tpu.vector_store %arg8[%c1, %c0_39, %c0_40, %c0_41], %72 {strides = array<i32>} : memref<4x1x8x8xbf16, #tpu.memory_space<vmem>>, vector<1x1x8x8xbf16>,
      %73 = vector.extract_strided_slice %36 {offsets = [0, 40], sizes = [8, 8], strides = [1, 1]} : vector<8x96xf32> to vector<8x8xf32>
      %c0_42 = arith.constant 0 : index
      %c40 = arith.constant 40 : index
      %74 = vector.load %arg4[%c0_42, %c40] : memref<1x96xf32, #tpu.memory_space<vmem>>, vector<1x8xf32>
      %75 = vector.broadcast %74 : vector<1x8xf32> to vector<8x8xf32>
      %76 = arith.addf %73, %75 : vector<8x8xf32>
      %77 = arith.truncf %76 : vector<8x8xf32> to vector<8x8xbf16>
      %78 = vector.shape_cast %77 : vector<8x8xbf16> to vector<1x8x8xbf16>
      %c1_43 = arith.constant 1 : index
      %c0_44 = arith.constant 0 : index
      %c0_45 = arith.constant 0 : index
      %c0_46 = arith.constant 0 : index
      %79 = vector.load %arg9[%c1_43, %c0_44, %c0_45, %c0_46] : memref<4x1x8x8xbf16, #tpu.memory_space<vmem>>, vector<1x1x8x8xbf16>
      %80 = vector.shape_cast %79 : vector<1x1x8x8xbf16> to vector<1x8x8xbf16>
      %81 = vector.shape_cast %78 : vector<1x8x8xbf16> to vector<1x1x8x8xbf16>
      tpu.vector_store %arg9[%c1_43, %c0_44, %c0_45, %c0_46], %81 {strides = array<i32>} : memref<4x1x8x8xbf16, #tpu.memory_space<vmem>>, vector<1x1x8x8xbf16>,
      %82 = vector.extract_strided_slice %36 {offsets = [0, 72], sizes = [8, 8], strides = [1, 1]} : vector<8x96xf32> to vector<8x8xf32>
      %c0_47 = arith.constant 0 : index
      %c72 = arith.constant 72 : index
      %83 = vector.load %arg4[%c0_47, %c72] : memref<1x96xf32, #tpu.memory_space<vmem>>, vector<1x8xf32>
      %84 = vector.broadcast %83 : vector<1x8xf32> to vector<8x8xf32>
      %85 = arith.addf %82, %84 : vector<8x8xf32>
      %86 = arith.truncf %85 : vector<8x8xf32> to vector<8x8xbf16>
      %87 = vector.shape_cast %86 : vector<8x8xbf16> to vector<1x8x8xbf16>
      %c1_48 = arith.constant 1 : index
      %c0_49 = arith.constant 0 : index
      %c0_50 = arith.constant 0 : index
      %c0_51 = arith.constant 0 : index
      %88 = vector.load %arg10[%c1_48, %c0_49, %c0_50, %c0_51] : memref<4x1x8x8xbf16, #tpu.memory_space<vmem>>, vector<1x1x8x8xbf16>
      %89 = vector.shape_cast %88 : vector<1x1x8x8xbf16> to vector<1x8x8xbf16>
      %90 = vector.shape_cast %87 : vector<1x8x8xbf16> to vector<1x1x8x8xbf16>
      tpu.vector_store %arg10[%c1_48, %c0_49, %c0_50, %c0_51], %90 {strides = array<i32>} : memref<4x1x8x8xbf16, #tpu.memory_space<vmem>>, vector<1x1x8x8xbf16>,
      %91 = vector.extract_strided_slice %36 {offsets = [0, 16], sizes = [8, 8], strides = [1, 1]} : vector<8x96xf32> to vector<8x8xf32>
      %c0_52 = arith.constant 0 : index
      %c16 = arith.constant 16 : index
      %92 = vector.load %arg4[%c0_52, %c16] : memref<1x96xf32, #tpu.memory_space<vmem>>, vector<1x8xf32>
      %93 = vector.broadcast %92 : vector<1x8xf32> to vector<8x8xf32>
      %94 = arith.addf %91, %93 : vector<8x8xf32>
      %95 = arith.truncf %94 : vector<8x8xf32> to vector<8x8xbf16>
      %96 = vector.shape_cast %95 : vector<8x8xbf16> to vector<1x8x8xbf16>
      %c2 = arith.constant 2 : index
      %c0_53 = arith.constant 0 : index
      %c0_54 = arith.constant 0 : index
      %c0_55 = arith.constant 0 : index
      %97 = vector.load %arg8[%c2, %c0_53, %c0_54, %c0_55] : memref<4x1x8x8xbf16, #tpu.memory_space<vmem>>, vector<1x1x8x8xbf16>
      %98 = vector.shape_cast %97 : vector<1x1x8x8xbf16> to vector<1x8x8xbf16>
      %99 = vector.shape_cast %96 : vector<1x8x8xbf16> to vector<1x1x8x8xbf16>
      tpu.vector_store %arg8[%c2, %c0_53, %c0_54, %c0_55], %99 {strides = array<i32>} : memref<4x1x8x8xbf16, #tpu.memory_space<vmem>>, vector<1x1x8x8xbf16>,
      %100 = vector.extract_strided_slice %36 {offsets = [0, 48], sizes = [8, 8], strides = [1, 1]} : vector<8x96xf32> to vector<8x8xf32>
      %c0_56 = arith.constant 0 : index
      %c48 = arith.constant 48 : index
      %101 = vector.load %arg4[%c0_56, %c48] : memref<1x96xf32, #tpu.memory_space<vmem>>, vector<1x8xf32>
      %102 = vector.broadcast %101 : vector<1x8xf32> to vector<8x8xf32>
      %103 = arith.addf %100, %102 : vector<8x8xf32>
      %104 = arith.truncf %103 : vector<8x8xf32> to vector<8x8xbf16>
      %105 = vector.shape_cast %104 : vector<8x8xbf16> to vector<1x8x8xbf16>
      %c2_57 = arith.constant 2 : index
      %c0_58 = arith.constant 0 : index
      %c0_59 = arith.constant 0 : index
      %c0_60 = arith.constant 0 : index
      %106 = vector.load %arg9[%c2_57, %c0_58, %c0_59, %c0_60] : memref<4x1x8x8xbf16, #tpu.memory_space<vmem>>, vector<1x1x8x8xbf16>
      %107 = vector.shape_cast %106 : vector<1x1x8x8xbf16> to vector<1x8x8xbf16>
      %108 = vector.shape_cast %105 : vector<1x8x8xbf16> to vector<1x1x8x8xbf16>
      tpu.vector_store %arg9[%c2_57, %c0_58, %c0_59, %c0_60], %108 {strides = array<i32>} : memref<4x1x8x8xbf16, #tpu.memory_space<vmem>>, vector<1x1x8x8xbf16>,
      %109 = vector.extract_strided_slice %36 {offsets = [0, 80], sizes = [8, 8], strides = [1, 1]} : vector<8x96xf32> to vector<8x8xf32>
      %c0_61 = arith.constant 0 : index
      %c80 = arith.constant 80 : index
      %110 = vector.load %arg4[%c0_61, %c80] : memref<1x96xf32, #tpu.memory_space<vmem>>, vector<1x8xf32>
      %111 = vector.broadcast %110 : vector<1x8xf32> to vector<8x8xf32>
      %112 = arith.addf %109, %111 : vector<8x8xf32>
      %113 = arith.truncf %112 : vector<8x8xf32> to vector<8x8xbf16>
      %114 = vector.shape_cast %113 : vector<8x8xbf16> to vector<1x8x8xbf16>
      %c2_62 = arith.constant 2 : index
      %c0_63 = arith.constant 0 : index
      %c0_64 = arith.constant 0 : index
      %c0_65 = arith.constant 0 : index
      %115 = vector.load %arg10[%c2_62, %c0_63, %c0_64, %c0_65] : memref<4x1x8x8xbf16, #tpu.memory_space<vmem>>, vector<1x1x8x8xbf16>
      %116 = vector.shape_cast %115 : vector<1x1x8x8xbf16> to vector<1x8x8xbf16>
      %117 = vector.shape_cast %114 : vector<1x8x8xbf16> to vector<1x1x8x8xbf16>
      tpu.vector_store %arg10[%c2_62, %c0_63, %c0_64, %c0_65], %117 {strides = array<i32>} : memref<4x1x8x8xbf16, #tpu.memory_space<vmem>>, vector<1x1x8x8xbf16>,
      %118 = vector.extract_strided_slice %36 {offsets = [0, 24], sizes = [8, 8], strides = [1, 1]} : vector<8x96xf32> to vector<8x8xf32>
      %c0_66 = arith.constant 0 : index
      %c24 = arith.constant 24 : index
      %119 = vector.load %arg4[%c0_66, %c24] : memref<1x96xf32, #tpu.memory_space<vmem>>, vector<1x8xf32>
      %120 = vector.broadcast %119 : vector<1x8xf32> to vector<8x8xf32>
      %121 = arith.addf %118, %120 : vector<8x8xf32>
      %122 = arith.truncf %121 : vector<8x8xf32> to vector<8x8xbf16>
      %123 = vector.shape_cast %122 : vector<8x8xbf16> to vector<1x8x8xbf16>
      %c3 = arith.constant 3 : index
      %c0_67 = arith.constant 0 : index
      %c0_68 = arith.constant 0 : index
      %c0_69 = arith.constant 0 : index
      %124 = vector.load %arg8[%c3, %c0_67, %c0_68, %c0_69] : memref<4x1x8x8xbf16, #tpu.memory_space<vmem>>, vector<1x1x8x8xbf16>
      %125 = vector.shape_cast %124 : vector<1x1x8x8xbf16> to vector<1x8x8xbf16>
      %126 = vector.shape_cast %123 : vector<1x8x8xbf16> to vector<1x1x8x8xbf16>
      tpu.vector_store %arg8[%c3, %c0_67, %c0_68, %c0_69], %126 {strides = array<i32>} : memref<4x1x8x8xbf16, #tpu.memory_space<vmem>>, vector<1x1x8x8xbf16>,
      %127 = vector.extract_strided_slice %36 {offsets = [0, 56], sizes = [8, 8], strides = [1, 1]} : vector<8x96xf32> to vector<8x8xf32>
      %c0_70 = arith.constant 0 : index
      %c56 = arith.constant 56 : index
      %128 = vector.load %arg4[%c0_70, %c56] : memref<1x96xf32, #tpu.memory_space<vmem>>, vector<1x8xf32>
      %129 = vector.broadcast %128 : vector<1x8xf32> to vector<8x8xf32>
      %130 = arith.addf %127, %129 : vector<8x8xf32>
      %131 = arith.truncf %130 : vector<8x8xf32> to vector<8x8xbf16>
      %132 = vector.shape_cast %131 : vector<8x8xbf16> to vector<1x8x8xbf16>
      %c3_71 = arith.constant 3 : index
      %c0_72 = arith.constant 0 : index
      %c0_73 = arith.constant 0 : index
      %c0_74 = arith.constant 0 : index
      %133 = vector.load %arg9[%c3_71, %c0_72, %c0_73, %c0_74] : memref<4x1x8x8xbf16, #tpu.memory_space<vmem>>, vector<1x1x8x8xbf16>
      %134 = vector.shape_cast %133 : vector<1x1x8x8xbf16> to vector<1x8x8xbf16>
      %135 = vector.shape_cast %132 : vector<1x8x8xbf16> to vector<1x1x8x8xbf16>
      tpu.vector_store %arg9[%c3_71, %c0_72, %c0_73, %c0_74], %135 {strides = array<i32>} : memref<4x1x8x8xbf16, #tpu.memory_space<vmem>>, vector<1x1x8x8xbf16>,
      %136 = vector.extract_strided_slice %36 {offsets = [0, 88], sizes = [8, 8], strides = [1, 1]} : vector<8x96xf32> to vector<8x8xf32>
      %c0_75 = arith.constant 0 : index
      %c88 = arith.constant 88 : index
      %137 = vector.load %arg4[%c0_75, %c88] : memref<1x96xf32, #tpu.memory_space<vmem>>, vector<1x8xf32>
      %138 = vector.broadcast %137 : vector<1x8xf32> to vector<8x8xf32>
      %139 = arith.addf %136, %138 : vector<8x8xf32>
      %140 = arith.truncf %139 : vector<8x8xf32> to vector<8x8xbf16>
      %141 = vector.shape_cast %140 : vector<8x8xbf16> to vector<1x8x8xbf16>
      %c3_76 = arith.constant 3 : index
      %c0_77 = arith.constant 0 : index
      %c0_78 = arith.constant 0 : index
      %c0_79 = arith.constant 0 : index
      %142 = vector.load %arg10[%c3_76, %c0_77, %c0_78, %c0_79] : memref<4x1x8x8xbf16, #tpu.memory_space<vmem>>, vector<1x1x8x8xbf16>
      %143 = vector.shape_cast %142 : vector<1x1x8x8xbf16> to vector<1x8x8xbf16>
      %144 = vector.shape_cast %141 : vector<1x8x8xbf16> to vector<1x1x8x8xbf16>
      tpu.vector_store %arg10[%c3_76, %c0_77, %c0_78, %c0_79], %144 {strides = array<i32>} : memref<4x1x8x8xbf16, #tpu.memory_space<vmem>>, vector<1x1x8x8xbf16>,
    } else {
    }
    %3 = arith.index_cast %arg1 : i32 to index
    %c0 = arith.constant 0 : index
    %c0_1 = arith.constant 0 : index
    %c0_2 = arith.constant 0 : index
    %4 = vector.load %arg8[%3, %c0, %c0_1, %c0_2] : memref<4x1x8x8xbf16, #tpu.memory_space<vmem>>, vector<1x1x8x8xbf16>
    %5 = vector.shape_cast %4 : vector<1x1x8x8xbf16> to vector<1x8x8xbf16>
    %6 = arith.index_cast %arg1 : i32 to index
    %c0_3 = arith.constant 0 : index
    %c0_4 = arith.constant 0 : index
    %c0_5 = arith.constant 0 : index
    %7 = vector.load %arg9[%6, %c0_3, %c0_4, %c0_5] : memref<4x1x8x8xbf16, #tpu.memory_space<vmem>>, vector<1x1x8x8xbf16>
    %8 = vector.shape_cast %7 : vector<1x1x8x8xbf16> to vector<1x8x8xbf16>
    %9 = arith.index_cast %arg1 : i32 to index
    %c0_6 = arith.constant 0 : index
    %c0_7 = arith.constant 0 : index
    %c0_8 = arith.constant 0 : index
    %10 = vector.load %arg10[%9, %c0_6, %c0_7, %c0_8] : memref<4x1x8x8xbf16, #tpu.memory_space<vmem>>, vector<1x1x8x8xbf16>
    %11 = vector.shape_cast %10 : vector<1x1x8x8xbf16> to vector<1x8x8xbf16>
    "tpu.trace_start"() <{level = 10 : i32, message = "bqd,bkd->bqk"}> : () -> ()
    %cst = arith.constant dense<0.000000e+00> : vector<1x8x8xf32>
    %12 = tpu.matmul %5, %8, %cst {dimension_numbers = #tpu.dot_dimension_numbers<[2], [2], [1], [1], [0, 0, 0, 1, 1, 1], [0], [0]>} : vector<1x8x8xbf16>, vector<1x8x8xbf16>, vector<1x8x8xf32> -> vector<1x8x8xf32>
    "tpu.trace_stop"() : () -> ()
    %cst_9 = arith.constant dense<0xFF800000> : vector<1x8xf32>
    %13 = vector.multi_reduction <maximumf>, %12, %cst_9 [2] : vector<1x8x8xf32> to vector<1x8xf32>
    %14 = vector.shape_cast %13 : vector<1x8xf32> to vector<1x8x1xf32>
    %15 = vector.broadcast %14 : vector<1x8x1xf32> to vector<1x8x8xf32>
    %16 = arith.subf %12, %15 : vector<1x8x8xf32>
    %17 = math.exp %16 : vector<1x8x8xf32>
    %cst_10 = arith.constant dense<0.000000e+00> : vector<1x8xf32>
    %18 = vector.multi_reduction <add>, %17, %cst_10 [2] : vector<1x8x8xf32> to vector<1x8xf32>
    %19 = vector.shape_cast %18 : vector<1x8xf32> to vector<1x8x1xf32>
    %20 = tpu.reciprocal %19 {approx = true} : vector<1x8x1xf32> -> vector<1x8x1xf32>
    %21 = vector.broadcast %20 : vector<1x8x1xf32> to vector<1x8x8xf32>
    %22 = arith.mulf %17, %21 : vector<1x8x8xf32>
    %23 = arith.truncf %22 : vector<1x8x8xf32> to vector<1x8x8xbf16>
    "tpu.trace_start"() <{level = 10 : i32, message = "bqk,bkd->bqd"}> : () -> ()
    %cst_11 = arith.constant dense<0.000000e+00> : vector<1x8x8xf32>
    %24 = tpu.matmul %23, %11, %cst_11 {dimension_numbers = #tpu.dot_dimension_numbers<[2], [1], [1], [2], [0, 0, 0, 1, 1, 2], [0], [0]>} : vector<1x8x8xbf16>, vector<1x8x8xbf16>, vector<1x8x8xf32> -> vector<1x8x8xf32>
    "tpu.trace_stop"() : () -> ()
    %25 = arith.truncf %24 : vector<1x8x8xf32> to vector<1x8x8xbf16>
    %26 = arith.index_cast %arg1 : i32 to index
    %c0_12 = arith.constant 0 : index
    %c0_13 = arith.constant 0 : index
    %c0_14 = arith.constant 0 : index
    %27 = vector.load %arg11[%26, %c0_12, %c0_13, %c0_14] : memref<4x1x8x8xbf16, #tpu.memory_space<vmem>>, vector<1x1x8x8xbf16>
    %28 = vector.shape_cast %27 : vector<1x1x8x8xbf16> to vector<1x8x8xbf16>
    %29 = vector.shape_cast %25 : vector<1x8x8xbf16> to vector<1x1x8x8xbf16>
    tpu.vector_store %arg11[%26, %c0_12, %c0_13, %c0_14], %29 {strides = array<i32>} : memref<4x1x8x8xbf16, #tpu.memory_space<vmem>>, vector<1x1x8x8xbf16>,
    %c3_i32 = arith.constant 3 : i32
    %30 = arith.cmpi eq, %arg1, %c3_i32 : i32
    %31 = arith.extui %30 : i1 to i32
    %c0_i32_15 = arith.constant 0 : i32
    %32 = arith.cmpi ne, %31, %c0_i32_15 : i32
    scf.if %32 {
      %c0_16 = arith.constant 0 : index
      %c0_17 = arith.constant 0 : index
      %c0_18 = arith.constant 0 : index
      %c0_19 = arith.constant 0 : index
      %33 = vector.load %arg11[%c0_16, %c0_17, %c0_18, %c0_19] : memref<4x1x8x8xbf16, #tpu.memory_space<vmem>>, vector<1x1x8x8xbf16>
      %34 = vector.shape_cast %33 : vector<1x1x8x8xbf16> to vector<1x8x8xbf16>
      %35 = vector.shape_cast %34 : vector<1x8x8xbf16> to vector<8x8xbf16>
      %c1 = arith.constant 1 : index
      %c0_20 = arith.constant 0 : index
      %c0_21 = arith.constant 0 : index
      %c0_22 = arith.constant 0 : index
      %36 = vector.load %arg11[%c1, %c0_20, %c0_21, %c0_22] : memref<4x1x8x8xbf16, #tpu.memory_space<vmem>>, vector<1x1x8x8xbf16>
      %37 = vector.shape_cast %36 : vector<1x1x8x8xbf16> to vector<1x8x8xbf16>
      %38 = vector.shape_cast %37 : vector<1x8x8xbf16> to vector<8x8xbf16>
      %c2 = arith.constant 2 : index
      %c0_23 = arith.constant 0 : index
      %c0_24 = arith.constant 0 : index
      %c0_25 = arith.constant 0 : index
      %39 = vector.load %arg11[%c2, %c0_23, %c0_24, %c0_25] : memref<4x1x8x8xbf16, #tpu.memory_space<vmem>>, vector<1x1x8x8xbf16>
      %40 = vector.shape_cast %39 : vector<1x1x8x8xbf16> to vector<1x8x8xbf16>
      %41 = vector.shape_cast %40 : vector<1x8x8xbf16> to vector<8x8xbf16>
      %c3 = arith.constant 3 : index
      %c0_26 = arith.constant 0 : index
      %c0_27 = arith.constant 0 : index
      %c0_28 = arith.constant 0 : index
      %42 = vector.load %arg11[%c3, %c0_26, %c0_27, %c0_28] : memref<4x1x8x8xbf16, #tpu.memory_space<vmem>>, vector<1x1x8x8xbf16>
      %43 = vector.shape_cast %42 : vector<1x1x8x8xbf16> to vector<1x8x8xbf16>
      %44 = vector.shape_cast %43 : vector<1x8x8xbf16> to vector<8x8xbf16>
      %45 = tpu.concatenate %35, %38, %41, %44 in 1 : vector<8x8xbf16>, vector<8x8xbf16>, vector<8x8xbf16>, vector<8x8xbf16> -> vector<8x32xbf16>
      %c0_29 = arith.constant 0 : index
      %c0_30 = arith.constant 0 : index
      %46 = vector.load %arg5[%c0_29, %c0_30] : memref<32x32xbf16, #tpu.memory_space<vmem>>, vector<32x32xbf16>
      %cst_31 = arith.constant dense<0.000000e+00> : vector<8x32xf32>
      %47 = tpu.matmul %45, %46, %cst_31 {dimension_numbers = #tpu.dot_dimension_numbers<[1], [0], [0], [1], [0, 0, 1, 1], [], []>} : vector<8x32xbf16>, vector<32x32xbf16>, vector<8x32xf32> -> vector<8x32xf32>
      %c0_32 = arith.constant 0 : index
      %c0_33 = arith.constant 0 : index
      %48 = vector.load %arg6[%c0_32, %c0_33] : memref<1x32xf32, #tpu.memory_space<vmem>>, vector<1x32xf32>
      %49 = vector.broadcast %48 : vector<1x32xf32> to vector<8x32xf32>
      %50 = arith.addf %47, %49 : vector<8x32xf32>
      %51 = vector.shape_cast %50 : vector<8x32xf32> to vector<1x8x32xf32>
      %c0_34 = arith.constant 0 : index
      %c0_35 = arith.constant 0 : index
      %c0_36 = arith.constant 0 : index
      %52 = vector.load %arg7[%c0_34, %c0_35, %c0_36] : memref<1x8x32xf32, #tpu.memory_space<vmem>>, vector<1x8x32xf32>
      tpu.vector_store %arg7[%c0_34, %c0_35, %c0_36], %51 {strides = array<i32>} : memref<1x8x32xf32, #tpu.memory_space<vmem>>, vector<1x8x32xf32>,
    } else {
    }
    return
  }
  func.func @transform_0(%arg0: i32, %arg1: i32) -> (i32, i32, i32) {
    %c0_i32 = arith.constant 0 : i32
    %c0_i32_0 = arith.constant 0 : i32
    %c0_i32_1 = arith.constant 0 : i32
    return %arg0, %c0_i32, %c0_i32_0 : i32, i32, i32
  }
  func.func @transform_1(%arg0: i32, %arg1: i32) -> (i32, i32) {
    %c0_i32 = arith.constant 0 : i32
    %c0_i32_0 = arith.constant 0 : i32
    %c0_i32_1 = arith.constant 0 : i32
    return %c0_i32, %c0_i32_0 : i32, i32
  }
  func.func @transform_2(%arg0: i32, %arg1: i32) -> (i32, i32) {
    %c0_i32 = arith.constant 0 : i32
    %c0_i32_0 = arith.constant 0 : i32
    %c0_i32_1 = arith.constant 0 : i32
    return %c0_i32, %c0_i32_0 : i32, i32
  }
  func.func @transform_3(%arg0: i32, %arg1: i32) -> (i32, i32) {
    %c0_i32 = arith.constant 0 : i32
    %c0_i32_0 = arith.constant 0 : i32
    %c0_i32_1 = arith.constant 0 : i32
    return %c0_i32, %c0_i32_0 : i32, i32
  }
  func.func @transform_4(%arg0: i32, %arg1: i32) -> (i32, i32) {
    %c0_i32 = arith.constant 0 : i32
    %c0_i32_0 = arith.constant 0 : i32
    %c0_i32_1 = arith.constant 0 : i32
    return %c0_i32, %c0_i32_0 : i32, i32
  }
  func.func @transform_5(%arg0: i32, %arg1: i32) -> (i32, i32, i32) {
    %c0_i32 = arith.constant 0 : i32
    %c0_i32_0 = arith.constant 0 : i32
    %c0_i32_1 = arith.constant 0 : i32
    return %arg0, %c0_i32, %c0_i32_0 : i32, i32, i32
  }
}

module attributes {stable_mosaic.version = 11 : i64} {
  func.func @kernel(%arg0: i32, %arg1: i32, %arg2: memref<1x8x32xbf16, #tpu.memory_space<vmem>>, %arg3: memref<32x96xbf16, #tpu.memory_space<vmem>>, %arg4: memref<1x96xf32, #tpu.memory_space<vmem>>, %arg5: memref<32x32xbf16, #tpu.memory_space<vmem>>, %arg6: memref<1x32xf32, #tpu.memory_space<vmem>>, %arg7: memref<1x8x32xf32, #tpu.memory_space<vmem>>, %arg8: memref<4x1x8x8xbf16, #tpu.memory_space<vmem>>, %arg9: memref<4x1x8x8xbf16, #tpu.memory_space<vmem>>, %arg10: memref<4x1x8x8xbf16, #tpu.memory_space<vmem>>, %arg11: memref<4x1x8x8xbf16, #tpu.memory_space<vmem>>) attributes {dimension_semantics = [#tpu.dimension_semantics<parallel>, #tpu.dimension_semantics<arbitrary>], iteration_bounds = array<i64: 2, 4>, scalar_prefetch = 0 : i64, scratch_operands = 4 : i64, tpu.core_type = #tpu.core_type<tc>, window_params = [{transform_indices = @transform_0, window_bounds = array<i64: 1, 8, 32>}, {pipeline_mode = #tpu.pipeline_mode<synchronous>, transform_indices = @transform_1, window_bounds = array<i64: 32, 96>}, {pipeline_mode = #tpu.pipeline_mode<synchronous>, transform_indices = @transform_2, window_bounds = array<i64: 1, 96>}, {pipeline_mode = #tpu.pipeline_mode<synchronous>, transform_indices = @transform_3, window_bounds = array<i64: 32, 32>}, {pipeline_mode = #tpu.pipeline_mode<synchronous>, transform_indices = @transform_4, window_bounds = array<i64: 1, 32>}, {transform_indices = @transform_5, window_bounds = array<i64: 1, 8, 32>}]} {
    %c0_i32 = arith.constant 0 : i32
    %0 = arith.cmpi eq, %arg1, %c0_i32 : i32
    %1 = arith.extui %0 : i1 to i32
    %c0_i32_0 = arith.constant 0 : i32
    %2 = arith.cmpi ne, %1, %c0_i32_0 : i32
    scf.if %2 {
      %c0_16 = arith.constant 0 : index
      %c0_17 = arith.constant 0 : index
      %c0_18 = arith.constant 0 : index
      %33 = vector.load %arg2[%c0_16, %c0_17, %c0_18] : memref<1x8x32xbf16, #tpu.memory_space<vmem>>, vector<1x8x32xbf16>
      %34 = vector.shape_cast %33 : vector<1x8x32xbf16> to vector<8x32xbf16>
      %c0_19 = arith.constant 0 : index
      %c0_20 = arith.constant 0 : index
      %35 = vector.load %arg3[%c0_19, %c0_20] : memref<32x96xbf16, #tpu.memory_space<vmem>>, vector<32x96xbf16>
      %cst_21 = arith.constant dense<0.000000e+00> : vector<8x96xf32>
      %36 = tpu.matmul %34, %35, %cst_21 {dimension_numbers = #tpu.dot_dimension_numbers<[1], [0], [0], [1], [0, 0, 1, 1], [], []>} : vector<8x32xbf16>, vector<32x96xbf16>, vector<8x96xf32> -> vector<8x96xf32>
      %37 = vector.extract_strided_slice %36 {offsets = [0, 0], sizes = [8, 8], strides = [1, 1]} : vector<8x96xf32> to vector<8x8xf32>
      %c0_22 = arith.constant 0 : index
      %c0_23 = arith.constant 0 : index
      %38 = vector.load %arg4[%c0_22, %c0_23] : memref<1x96xf32, #tpu.memory_space<vmem>>, vector<1x8xf32>
      %39 = vector.broadcast %38 : vector<1x8xf32> to vector<8x8xf32>
      %40 = arith.addf %37, %39 : vector<8x8xf32>
      %41 = arith.truncf %40 : vector<8x8xf32> to vector<8x8xbf16>
      %42 = vector.shape_cast %41 : vector<8x8xbf16> to vector<1x8x8xbf16>
      %c0_24 = arith.constant 0 : index
      %c0_25 = arith.constant 0 : index
      %c0_26 = arith.constant 0 : index
      %c0_27 = arith.constant 0 : index
      %43 = vector.load %arg8[%c0_24, %c0_25, %c0_26, %c0_27] : memref<4x1x8x8xbf16, #tpu.memory_space<vmem>>, vector<1x1x8x8xbf16>
      %44 = vector.shape_cast %43 : vector<1x1x8x8xbf16> to vector<1x8x8xbf16>
      %45 = vector.shape_cast %42 : vector<1x8x8xbf16> to vector<1x1x8x8xbf16>
      tpu.vector_store %arg8[%c0_24, %c0_25, %c0_26, %c0_27], %45 {strides = array<i32>} : memref<4x1x8x8xbf16, #tpu.memory_space<vmem>>, vector<1x1x8x8xbf16>,
      %46 = vector.extract_strided_slice %36 {offsets = [0, 32], sizes = [8, 8], strides = [1, 1]} : vector<8x96xf32> to vector<8x8xf32>
      %c0_28 = arith.constant 0 : index
      %c32 = arith.constant 32 : index
      %47 = vector.load %arg4[%c0_28, %c32] : memref<1x96xf32, #tpu.memory_space<vmem>>, vector<1x8xf32>
      %48 = vector.broadcast %47 : vector<1x8xf32> to vector<8x8xf32>
      %49 = arith.addf %46, %48 : vector<8x8xf32>
      %50 = arith.truncf %49 : vector<8x8xf32> to vector<8x8xbf16>
      %51 = vector.shape_cast %50 : vector<8x8xbf16> to vector<1x8x8xbf16>
      %c0_29 = arith.constant 0 : index
      %c0_30 = arith.constant 0 : index
      %c0_31 = arith.constant 0 : index
      %c0_32 = arith.constant 0 : index
      %52 = vector.load %arg9[%c0_29, %c0_30, %c0_31, %c0_32] : memref<4x1x8x8xbf16, #tpu.memory_space<vmem>>, vector<1x1x8x8xbf16>
      %53 = vector.shape_cast %52 : vector<1x1x8x8xbf16> to vector<1x8x8xbf16>
      %54 = vector.shape_cast %51 : vector<1x8x8xbf16> to vector<1x1x8x8xbf16>
      tpu.vector_store %arg9[%c0_29, %c0_30, %c0_31, %c0_32], %54 {strides = array<i32>} : memref<4x1x8x8xbf16, #tpu.memory_space<vmem>>, vector<1x1x8x8xbf16>,
      %55 = vector.extract_strided_slice %36 {offsets = [0, 64], sizes = [8, 8], strides = [1, 1]} : vector<8x96xf32> to vector<8x8xf32>
      %c0_33 = arith.constant 0 : index
      %c64 = arith.constant 64 : index
      %56 = vector.load %arg4[%c0_33, %c64] : memref<1x96xf32, #tpu.memory_space<vmem>>, vector<1x8xf32>
      %57 = vector.broadcast %56 : vector<1x8xf32> to vector<8x8xf32>
      %58 = arith.addf %55, %57 : vector<8x8xf32>
      %59 = arith.truncf %58 : vector<8x8xf32> to vector<8x8xbf16>
      %60 = vector.shape_cast %59 : vector<8x8xbf16> to vector<1x8x8xbf16>
      %c0_34 = arith.constant 0 : index
      %c0_35 = arith.constant 0 : index
      %c0_36 = arith.constant 0 : index
      %c0_37 = arith.constant 0 : index
      %61 = vector.load %arg10[%c0_34, %c0_35, %c0_36, %c0_37] : memref<4x1x8x8xbf16, #tpu.memory_space<vmem>>, vector<1x1x8x8xbf16>
      %62 = vector.shape_cast %61 : vector<1x1x8x8xbf16> to vector<1x8x8xbf16>
      %63 = vector.shape_cast %60 : vector<1x8x8xbf16> to vector<1x1x8x8xbf16>
      tpu.vector_store %arg10[%c0_34, %c0_35, %c0_36, %c0_37], %63 {strides = array<i32>} : memref<4x1x8x8xbf16, #tpu.memory_space<vmem>>, vector<1x1x8x8xbf16>,
      %64 = vector.extract_strided_slice %36 {offsets = [0, 8], sizes = [8, 8], strides = [1, 1]} : vector<8x96xf32> to vector<8x8xf32>
      %c0_38 = arith.constant 0 : index
      %c8 = arith.constant 8 : index
      %65 = vector.load %arg4[%c0_38, %c8] : memref<1x96xf32, #tpu.memory_space<vmem>>, vector<1x8xf32>
      %66 = vector.broadcast %65 : vector<1x8xf32> to vector<8x8xf32>
      %67 = arith.addf %64, %66 : vector<8x8xf32>
      %68 = arith.truncf %67 : vector<8x8xf32> to vector<8x8xbf16>
      %69 = vector.shape_cast %68 : vector<8x8xbf16> to vector<1x8x8xbf16>
      %c1 = arith.constant 1 : index
      %c0_39 = arith.constant 0 : index
      %c0_40 = arith.constant 0 : index
      %c0_41 = arith.constant 0 : index
      %70 = vector.load %arg8[%c1, %c0_39, %c0_40, %c0_41] : memref<4x1x8x8xbf16, #tpu.memory_space<vmem>>, vector<1x1x8x8xbf16>
      %71 = vector.shape_cast %70 : vector<1x1x8x8xbf16> to vector<1x8x8xbf16>
      %72 = vector.shape_cast %69 : vector<1x8x8xbf16> to vector<1x1x8x8xbf16>
      tpu.vector_store %arg8[%c1, %c0_39, %c0_40, %c0_41], %72 {strides = array<i32>} : memref<4x1x8x8xbf16, #tpu.memory_space<vmem>>, vector<1x1x8x8xbf16>,
      %73 = vector.extract_strided_slice %36 {offsets = [0, 40], sizes = [8, 8], strides = [1, 1]} : vector<8x96xf32> to vector<8x8xf32>
      %c0_42 = arith.constant 0 : index
      %c40 = arith.constant 40 : index
      %74 = vector.load %arg4[%c0_42, %c40] : memref<1x96xf32, #tpu.memory_space<vmem>>, vector<1x8xf32>
      %75 = vector.broadcast %74 : vector<1x8xf32> to vector<8x8xf32>
      %76 = arith.addf %73, %75 : vector<8x8xf32>
      %77 = arith.truncf %76 : vector<8x8xf32> to vector<8x8xbf16>
      %78 = vector.shape_cast %77 : vector<8x8xbf16> to vector<1x8x8xbf16>
      %c1_43 = arith.constant 1 : index
      %c0_44 = arith.constant 0 : index
      %c0_45 = arith.constant 0 : index
      %c0_46 = arith.constant 0 : index
      %79 = vector.load %arg9[%c1_43, %c0_44, %c0_45, %c0_46] : memref<4x1x8x8xbf16, #tpu.memory_space<vmem>>, vector<1x1x8x8xbf16>
      %80 = vector.shape_cast %79 : vector<1x1x8x8xbf16> to vector<1x8x8xbf16>
      %81 = vector.shape_cast %78 : vector<1x8x8xbf16> to vector<1x1x8x8xbf16>
      tpu.vector_store %arg9[%c1_43, %c0_44, %c0_45, %c0_46], %81 {strides = array<i32>} : memref<4x1x8x8xbf16, #tpu.memory_space<vmem>>, vector<1x1x8x8xbf16>,
      %82 = vector.extract_strided_slice %36 {offsets = [0, 72], sizes = [8, 8], strides = [1, 1]} : vector<8x96xf32> to vector<8x8xf32>
      %c0_47 = arith.constant 0 : index
      %c72 = arith.constant 72 : index
      %83 = vector.load %arg4[%c0_47, %c72] : memref<1x96xf32, #tpu.memory_space<vmem>>, vector<1x8xf32>
      %84 = vector.broadcast %83 : vector<1x8xf32> to vector<8x8xf32>
      %85 = arith.addf %82, %84 : vector<8x8xf32>
      %86 = arith.truncf %85 : vector<8x8xf32> to vector<8x8xbf16>
      %87 = vector.shape_cast %86 : vector<8x8xbf16> to vector<1x8x8xbf16>
      %c1_48 = arith.constant 1 : index
      %c0_49 = arith.constant 0 : index
      %c0_50 = arith.constant 0 : index
      %c0_51 = arith.constant 0 : index
      %88 = vector.load %arg10[%c1_48, %c0_49, %c0_50, %c0_51] : memref<4x1x8x8xbf16, #tpu.memory_space<vmem>>, vector<1x1x8x8xbf16>
      %89 = vector.shape_cast %88 : vector<1x1x8x8xbf16> to vector<1x8x8xbf16>
      %90 = vector.shape_cast %87 : vector<1x8x8xbf16> to vector<1x1x8x8xbf16>
      tpu.vector_store %arg10[%c1_48, %c0_49, %c0_50, %c0_51], %90 {strides = array<i32>} : memref<4x1x8x8xbf16, #tpu.memory_space<vmem>>, vector<1x1x8x8xbf16>,
      %91 = vector.extract_strided_slice %36 {offsets = [0, 16], sizes = [8, 8], strides = [1, 1]} : vector<8x96xf32> to vector<8x8xf32>
      %c0_52 = arith.constant 0 : index
      %c16 = arith.constant 16 : index
      %92 = vector.load %arg4[%c0_52, %c16] : memref<1x96xf32, #tpu.memory_space<vmem>>, vector<1x8xf32>
      %93 = vector.broadcast %92 : vector<1x8xf32> to vector<8x8xf32>
      %94 = arith.addf %91, %93 : vector<8x8xf32>
      %95 = arith.truncf %94 : vector<8x8xf32> to vector<8x8xbf16>
      %96 = vector.shape_cast %95 : vector<8x8xbf16> to vector<1x8x8xbf16>
      %c2 = arith.constant 2 : index
      %c0_53 = arith.constant 0 : index
      %c0_54 = arith.constant 0 : index
      %c0_55 = arith.constant 0 : index
      %97 = vector.load %arg8[%c2, %c0_53, %c0_54, %c0_55] : memref<4x1x8x8xbf16, #tpu.memory_space<vmem>>, vector<1x1x8x8xbf16>
      %98 = vector.shape_cast %97 : vector<1x1x8x8xbf16> to vector<1x8x8xbf16>
      %99 = vector.shape_cast %96 : vector<1x8x8xbf16> to vector<1x1x8x8xbf16>
      tpu.vector_store %arg8[%c2, %c0_53, %c0_54, %c0_55], %99 {strides = array<i32>} : memref<4x1x8x8xbf16, #tpu.memory_space<vmem>>, vector<1x1x8x8xbf16>,
      %100 = vector.extract_strided_slice %36 {offsets = [0, 48], sizes = [8, 8], strides = [1, 1]} : vector<8x96xf32> to vector<8x8xf32>
      %c0_56 = arith.constant 0 : index
      %c48 = arith.constant 48 : index
      %101 = vector.load %arg4[%c0_56, %c48] : memref<1x96xf32, #tpu.memory_space<vmem>>, vector<1x8xf32>
      %102 = vector.broadcast %101 : vector<1x8xf32> to vector<8x8xf32>
      %103 = arith.addf %100, %102 : vector<8x8xf32>
      %104 = arith.truncf %103 : vector<8x8xf32> to vector<8x8xbf16>
      %105 = vector.shape_cast %104 : vector<8x8xbf16> to vector<1x8x8xbf16>
      %c2_57 = arith.constant 2 : index
      %c0_58 = arith.constant 0 : index
      %c0_59 = arith.constant 0 : index
      %c0_60 = arith.constant 0 : index
      %106 = vector.load %arg9[%c2_57, %c0_58, %c0_59, %c0_60] : memref<4x1x8x8xbf16, #tpu.memory_space<vmem>>, vector<1x1x8x8xbf16>
      %107 = vector.shape_cast %106 : vector<1x1x8x8xbf16> to vector<1x8x8xbf16>
      %108 = vector.shape_cast %105 : vector<1x8x8xbf16> to vector<1x1x8x8xbf16>
      tpu.vector_store %arg9[%c2_57, %c0_58, %c0_59, %c0_60], %108 {strides = array<i32>} : memref<4x1x8x8xbf16, #tpu.memory_space<vmem>>, vector<1x1x8x8xbf16>,
      %109 = vector.extract_strided_slice %36 {offsets = [0, 80], sizes = [8, 8], strides = [1, 1]} : vector<8x96xf32> to vector<8x8xf32>
      %c0_61 = arith.constant 0 : index
      %c80 = arith.constant 80 : index
      %110 = vector.load %arg4[%c0_61, %c80] : memref<1x96xf32, #tpu.memory_space<vmem>>, vector<1x8xf32>
      %111 = vector.broadcast %110 : vector<1x8xf32> to vector<8x8xf32>
      %112 = arith.addf %109, %111 : vector<8x8xf32>
      %113 = arith.truncf %112 : vector<8x8xf32> to vector<8x8xbf16>
      %114 = vector.shape_cast %113 : vector<8x8xbf16> to vector<1x8x8xbf16>
      %c2_62 = arith.constant 2 : index
      %c0_63 = arith.constant 0 : index
      %c0_64 = arith.constant 0 : index
      %c0_65 = arith.constant 0 : index
      %115 = vector.load %arg10[%c2_62, %c0_63, %c0_64, %c0_65] : memref<4x1x8x8xbf16, #tpu.memory_space<vmem>>, vector<1x1x8x8xbf16>
      %116 = vector.shape_cast %115 : vector<1x1x8x8xbf16> to vector<1x8x8xbf16>
      %117 = vector.shape_cast %114 : vector<1x8x8xbf16> to vector<1x1x8x8xbf16>
      tpu.vector_store %arg10[%c2_62, %c0_63, %c0_64, %c0_65], %117 {strides = array<i32>} : memref<4x1x8x8xbf16, #tpu.memory_space<vmem>>, vector<1x1x8x8xbf16>,
      %118 = vector.extract_strided_slice %36 {offsets = [0, 24], sizes = [8, 8], strides = [1, 1]} : vector<8x96xf32> to vector<8x8xf32>
      %c0_66 = arith.constant 0 : index
      %c24 = arith.constant 24 : index
      %119 = vector.load %arg4[%c0_66, %c24] : memref<1x96xf32, #tpu.memory_space<vmem>>, vector<1x8xf32>
      %120 = vector.broadcast %119 : vector<1x8xf32> to vector<8x8xf32>
      %121 = arith.addf %118, %120 : vector<8x8xf32>
      %122 = arith.truncf %121 : vector<8x8xf32> to vector<8x8xbf16>
      %123 = vector.shape_cast %122 : vector<8x8xbf16> to vector<1x8x8xbf16>
      %c3 = arith.constant 3 : index
      %c0_67 = arith.constant 0 : index
      %c0_68 = arith.constant 0 : index
      %c0_69 = arith.constant 0 : index
      %124 = vector.load %arg8[%c3, %c0_67, %c0_68, %c0_69] : memref<4x1x8x8xbf16, #tpu.memory_space<vmem>>, vector<1x1x8x8xbf16>
      %125 = vector.shape_cast %124 : vector<1x1x8x8xbf16> to vector<1x8x8xbf16>
      %126 = vector.shape_cast %123 : vector<1x8x8xbf16> to vector<1x1x8x8xbf16>
      tpu.vector_store %arg8[%c3, %c0_67, %c0_68, %c0_69], %126 {strides = array<i32>} : memref<4x1x8x8xbf16, #tpu.memory_space<vmem>>, vector<1x1x8x8xbf16>,
      %127 = vector.extract_strided_slice %36 {offsets = [0, 56], sizes = [8, 8], strides = [1, 1]} : vector<8x96xf32> to vector<8x8xf32>
      %c0_70 = arith.constant 0 : index
      %c56 = arith.constant 56 : index
      %128 = vector.load %arg4[%c0_70, %c56] : memref<1x96xf32, #tpu.memory_space<vmem>>, vector<1x8xf32>
      %129 = vector.broadcast %128 : vector<1x8xf32> to vector<8x8xf32>
      %130 = arith.addf %127, %129 : vector<8x8xf32>
      %131 = arith.truncf %130 : vector<8x8xf32> to vector<8x8xbf16>
      %132 = vector.shape_cast %131 : vector<8x8xbf16> to vector<1x8x8xbf16>
      %c3_71 = arith.constant 3 : index
      %c0_72 = arith.constant 0 : index
      %c0_73 = arith.constant 0 : index
      %c0_74 = arith.constant 0 : index
      %133 = vector.load %arg9[%c3_71, %c0_72, %c0_73, %c0_74] : memref<4x1x8x8xbf16, #tpu.memory_space<vmem>>, vector<1x1x8x8xbf16>
      %134 = vector.shape_cast %133 : vector<1x1x8x8xbf16> to vector<1x8x8xbf16>
      %135 = vector.shape_cast %132 : vector<1x8x8xbf16> to vector<1x1x8x8xbf16>
      tpu.vector_store %arg9[%c3_71, %c0_72, %c0_73, %c0_74], %135 {strides = array<i32>} : memref<4x1x8x8xbf16, #tpu.memory_space<vmem>>, vector<1x1x8x8xbf16>,
      %136 = vector.extract_strided_slice %36 {offsets = [0, 88], sizes = [8, 8], strides = [1, 1]} : vector<8x96xf32> to vector<8x8xf32>
      %c0_75 = arith.constant 0 : index
      %c88 = arith.constant 88 : index
      %137 = vector.load %arg4[%c0_75, %c88] : memref<1x96xf32, #tpu.memory_space<vmem>>, vector<1x8xf32>
      %138 = vector.broadcast %137 : vector<1x8xf32> to vector<8x8xf32>
      %139 = arith.addf %136, %138 : vector<8x8xf32>
      %140 = arith.truncf %139 : vector<8x8xf32> to vector<8x8xbf16>
      %141 = vector.shape_cast %140 : vector<8x8xbf16> to vector<1x8x8xbf16>
      %c3_76 = arith.constant 3 : index
      %c0_77 = arith.constant 0 : index
      %c0_78 = arith.constant 0 : index
      %c0_79 = arith.constant 0 : index
      %142 = vector.load %arg10[%c3_76, %c0_77, %c0_78, %c0_79] : memref<4x1x8x8xbf16, #tpu.memory_space<vmem>>, vector<1x1x8x8xbf16>
      %143 = vector.shape_cast %142 : vector<1x1x8x8xbf16> to vector<1x8x8xbf16>
      %144 = vector.shape_cast %141 : vector<1x8x8xbf16> to vector<1x1x8x8xbf16>
      tpu.vector_store %arg10[%c3_76, %c0_77, %c0_78, %c0_79], %144 {strides = array<i32>} : memref<4x1x8x8xbf16, #tpu.memory_space<vmem>>, vector<1x1x8x8xbf16>,
    } else {
    }
    %3 = arith.index_cast %arg1 : i32 to index
    %c0 = arith.constant 0 : index
    %c0_1 = arith.constant 0 : index
    %c0_2 = arith.constant 0 : index
    %4 = vector.load %arg8[%3, %c0, %c0_1, %c0_2] : memref<4x1x8x8xbf16, #tpu.memory_space<vmem>>, vector<1x1x8x8xbf16>
    %5 = vector.shape_cast %4 : vector<1x1x8x8xbf16> to vector<1x8x8xbf16>
    %6 = arith.index_cast %arg1 : i32 to index
    %c0_3 = arith.constant 0 : index
    %c0_4 = arith.constant 0 : index
    %c0_5 = arith.constant 0 : index
    %7 = vector.load %arg9[%6, %c0_3, %c0_4, %c0_5] : memref<4x1x8x8xbf16, #tpu.memory_space<vmem>>, vector<1x1x8x8xbf16>
    %8 = vector.shape_cast %7 : vector<1x1x8x8xbf16> to vector<1x8x8xbf16>
    %9 = arith.index_cast %arg1 : i32 to index
    %c0_6 = arith.constant 0 : index
    %c0_7 = arith.constant 0 : index
    %c0_8 = arith.constant 0 : index
    %10 = vector.load %arg10[%9, %c0_6, %c0_7, %c0_8] : memref<4x1x8x8xbf16, #tpu.memory_space<vmem>>, vector<1x1x8x8xbf16>
    %11 = vector.shape_cast %10 : vector<1x1x8x8xbf16> to vector<1x8x8xbf16>
    "tpu.trace_start"() <{level = 10 : i32, message = "bqd,bkd->bqk"}> : () -> ()
    %cst = arith.constant dense<0.000000e+00> : vector<1x8x8xf32>
    %12 = tpu.matmul %5, %8, %cst {dimension_numbers = #tpu.dot_dimension_numbers<[2], [2], [1], [1], [0, 0, 0, 1, 1, 1], [0], [0]>} : vector<1x8x8xbf16>, vector<1x8x8xbf16>, vector<1x8x8xf32> -> vector<1x8x8xf32>
    "tpu.trace_stop"() : () -> ()
    %cst_9 = arith.constant dense<0xFF800000> : vector<1x8xf32>
    %13 = vector.multi_reduction <maximumf>, %12, %cst_9 [2] : vector<1x8x8xf32> to vector<1x8xf32>
    %14 = vector.shape_cast %13 : vector<1x8xf32> to vector<1x8x1xf32>
    %15 = vector.broadcast %14 : vector<1x8x1xf32> to vector<1x8x8xf32>
    %16 = arith.subf %12, %15 : vector<1x8x8xf32>
    %17 = math.exp %16 : vector<1x8x8xf32>
    %cst_10 = arith.constant dense<0.000000e+00> : vector<1x8xf32>
    %18 = vector.multi_reduction <add>, %17, %cst_10 [2] : vector<1x8x8xf32> to vector<1x8xf32>
    %19 = vector.shape_cast %18 : vector<1x8xf32> to vector<1x8x1xf32>
    %20 = tpu.reciprocal %19 {approx = true} : vector<1x8x1xf32> -> vector<1x8x1xf32>
    %21 = vector.broadcast %20 : vector<1x8x1xf32> to vector<1x8x8xf32>
    %22 = arith.mulf %17, %21 : vector<1x8x8xf32>
    %23 = arith.truncf %22 : vector<1x8x8xf32> to vector<1x8x8xbf16>
    "tpu.trace_start"() <{level = 10 : i32, message = "bqk,bkd->bqd"}> : () -> ()
    %cst_11 = arith.constant dense<0.000000e+00> : vector<1x8x8xf32>
    %24 = tpu.matmul %23, %11, %cst_11 {dimension_numbers = #tpu.dot_dimension_numbers<[2], [1], [1], [2], [0, 0, 0, 1, 1, 2], [0], [0]>} : vector<1x8x8xbf16>, vector<1x8x8xbf16>, vector<1x8x8xf32> -> vector<1x8x8xf32>
    "tpu.trace_stop"() : () -> ()
    %25 = arith.truncf %24 : vector<1x8x8xf32> to vector<1x8x8xbf16>
    %26 = arith.index_cast %arg1 : i32 to index
    %c0_12 = arith.constant 0 : index
    %c0_13 = arith.constant 0 : index
    %c0_14 = arith.constant 0 : index
    %27 = vector.load %arg11[%26, %c0_12, %c0_13, %c0_14] : memref<4x1x8x8xbf16, #tpu.memory_space<vmem>>, vector<1x1x8x8xbf16>
    %28 = vector.shape_cast %27 : vector<1x1x8x8xbf16> to vector<1x8x8xbf16>
    %29 = vector.shape_cast %25 : vector<1x8x8xbf16> to vector<1x1x8x8xbf16>
    tpu.vector_store %arg11[%26, %c0_12, %c0_13, %c0_14], %29 {strides = array<i32>} : memref<4x1x8x8xbf16, #tpu.memory_space<vmem>>, vector<1x1x8x8xbf16>,
    %c3_i32 = arith.constant 3 : i32
    %30 = arith.cmpi eq, %arg1, %c3_i32 : i32
    %31 = arith.extui %30 : i1 to i32
    %c0_i32_15 = arith.constant 0 : i32
    %32 = arith.cmpi ne, %31, %c0_i32_15 : i32
    scf.if %32 {
      %c0_16 = arith.constant 0 : index
      %c0_17 = arith.constant 0 : index
      %c0_18 = arith.constant 0 : index
      %c0_19 = arith.constant 0 : index
      %33 = vector.load %arg11[%c0_16, %c0_17, %c0_18, %c0_19] : memref<4x1x8x8xbf16, #tpu.memory_space<vmem>>, vector<1x1x8x8xbf16>
      %34 = vector.shape_cast %33 : vector<1x1x8x8xbf16> to vector<1x8x8xbf16>
      %35 = vector.shape_cast %34 : vector<1x8x8xbf16> to vector<8x8xbf16>
      %c1 = arith.constant 1 : index
      %c0_20 = arith.constant 0 : index
      %c0_21 = arith.constant 0 : index
      %c0_22 = arith.constant 0 : index
      %36 = vector.load %arg11[%c1, %c0_20, %c0_21, %c0_22] : memref<4x1x8x8xbf16, #tpu.memory_space<vmem>>, vector<1x1x8x8xbf16>
      %37 = vector.shape_cast %36 : vector<1x1x8x8xbf16> to vector<1x8x8xbf16>
      %38 = vector.shape_cast %37 : vector<1x8x8xbf16> to vector<8x8xbf16>
      %c2 = arith.constant 2 : index
      %c0_23 = arith.constant 0 : index
      %c0_24 = arith.constant 0 : index
      %c0_25 = arith.constant 0 : index
      %39 = vector.load %arg11[%c2, %c0_23, %c0_24, %c0_25] : memref<4x1x8x8xbf16, #tpu.memory_space<vmem>>, vector<1x1x8x8xbf16>
      %40 = vector.shape_cast %39 : vector<1x1x8x8xbf16> to vector<1x8x8xbf16>
      %41 = vector.shape_cast %40 : vector<1x8x8xbf16> to vector<8x8xbf16>
      %c3 = arith.constant 3 : index
      %c0_26 = arith.constant 0 : index
      %c0_27 = arith.constant 0 : index
      %c0_28 = arith.constant 0 : index
      %42 = vector.load %arg11[%c3, %c0_26, %c0_27, %c0_28] : memref<4x1x8x8xbf16, #tpu.memory_space<vmem>>, vector<1x1x8x8xbf16>
      %43 = vector.shape_cast %42 : vector<1x1x8x8xbf16> to vector<1x8x8xbf16>
      %44 = vector.shape_cast %43 : vector<1x8x8xbf16> to vector<8x8xbf16>
      %45 = tpu.concatenate %35, %38, %41, %44 in 1 : vector<8x8xbf16>, vector<8x8xbf16>, vector<8x8xbf16>, vector<8x8xbf16> -> vector<8x32xbf16>
      %c0_29 = arith.constant 0 : index
      %c0_30 = arith.constant 0 : index
      %46 = vector.load %arg5[%c0_29, %c0_30] : memref<32x32xbf16, #tpu.memory_space<vmem>>, vector<32x32xbf16>
      %cst_31 = arith.constant dense<0.000000e+00> : vector<8x32xf32>
      %47 = tpu.matmul %45, %46, %cst_31 {dimension_numbers = #tpu.dot_dimension_numbers<[1], [0], [0], [1], [0, 0, 1, 1], [], []>} : vector<8x32xbf16>, vector<32x32xbf16>, vector<8x32xf32> -> vector<8x32xf32>
      %c0_32 = arith.constant 0 : index
      %c0_33 = arith.constant 0 : index
      %48 = vector.load %arg6[%c0_32, %c0_33] : memref<1x32xf32, #tpu.memory_space<vmem>>, vector<1x32xf32>
      %49 = vector.broadcast %48 : vector<1x32xf32> to vector<8x32xf32>
      %50 = arith.addf %47, %49 : vector<8x32xf32>
      %51 = vector.shape_cast %50 : vector<8x32xf32> to vector<1x8x32xf32>
      %c0_34 = arith.constant 0 : index
      %c0_35 = arith.constant 0 : index
      %c0_36 = arith.constant 0 : index
      %52 = vector.load %arg7[%c0_34, %c0_35, %c0_36] : memref<1x8x32xf32, #tpu.memory_space<vmem>>, vector<1x8x32xf32>
      tpu.vector_store %arg7[%c0_34, %c0_35, %c0_36], %51 {strides = array<i32>} : memref<1x8x32xf32, #tpu.memory_space<vmem>>, vector<1x8x32xf32>,
    } else {
    }
    return
  }
  func.func @transform_0(%arg0: i32, %arg1: i32) -> (i32, i32, i32) {
    %c0_i32 = arith.constant 0 : i32
    %c0_i32_0 = arith.constant 0 : i32
    %c0_i32_1 = arith.constant 0 : i32
    return %arg0, %c0_i32, %c0_i32_0 : i32, i32, i32
  }
  func.func @transform_1(%arg0: i32, %arg1: i32) -> (i32, i32) {
    %c0_i32 = arith.constant 0 : i32
    %c0_i32_0 = arith.constant 0 : i32
    %c0_i32_1 = arith.constant 0 : i32
    return %c0_i32, %c0_i32_0 : i32, i32
  }
  func.func @transform_2(%arg0: i32, %arg1: i32) -> (i32, i32) {
    %c0_i32 = arith.constant 0 : i32
    %c0_i32_0 = arith.constant 0 : i32
    %c0_i32_1 = arith.constant 0 : i32
    return %c0_i32, %c0_i32_0 : i32, i32
  }
  func.func @transform_3(%arg0: i32, %arg1: i32) -> (i32, i32) {
    %c0_i32 = arith.constant 0 : i32
    %c0_i32_0 = arith.constant 0 : i32
    %c0_i32_1 = arith.constant 0 : i32
    return %c0_i32, %c0_i32_0 : i32, i32
  }
  func.func @transform_4(%arg0: i32, %arg1: i32) -> (i32, i32) {
    %c0_i32 = arith.constant 0 : i32
    %c0_i32_0 = arith.constant 0 : i32
    %c0_i32_1 = arith.constant 0 : i32
    return %c0_i32, %c0_i32_0 : i32, i32
  }
  func.func @transform_5(%arg0: i32, %arg1: i32) -> (i32, i32, i32) {
    %c0_i32 = arith.constant 0 : i32
    %c0_i32_0 = arith.constant 0 : i32
    %c0_i32_1 = arith.constant 0 : i32
    return %arg0, %c0_i32, %c0_i32_0 : i32, i32, i32
  }
}

</mosaic_0001>

<bundles_post_ra>
// kernel: tpu_custom_call.1
= control target key start
LH: loop header
LB: loop body
LE: loop exit
PB: predicated region body
PF: predicated region fallthrough
CT: control target
= control target key end

     0   :  { %s1669_s0 = inlined_call_operand.hbm [shape: bf16[2,8,32], index: 0, kind: input, shape index: {}]   ;;  %s1670_s1 = inlined_call_operand.hbm [shape: bf16[32,96], index: 1, kind: input, shape index: {}]   ;;  %s1671_s2 = inlined_call_operand.vmem [shape: f32[1,96], index: 2, kind: input, shape index: {}]   ;;  %s1672_s3 = inlined_call_operand.hbm [shape: bf16[32,32], index: 3, kind: input, shape index: {}]   ;;  %s1673_s4 = inlined_call_operand.vmem [shape: f32[1,32], index: 4, kind: input, shape index: {}]   ;;  %s1674_s5 = inlined_call_operand.hbm [shape: f32[2,8,32], index: 5, kind: output, shape index: {}]  }
   0x1   :  { %1681 = sst [smem:[#allocation18_spill]] %s1670_s1 }
   0x2   :  { %10 = vsyncpa [#allocation7], 0 }
   0x3   :  { %12 = vsyncpa [#allocation7 + $0x1], 0 }
   0x4   :  { %13 = vsyncpa [#allocation10], 0 }
   0x5   :  { %14 = vsyncpa [#allocation8], 0 }
   0x6   :  { %16 = vsyncpa [#allocation8 + $0x1], 0  ;;  %s1372_s18 = smov 0   ;;  %s1374_s19 = smov 0  }
   0x7   :  { %s1376_s20 = smov 0   ;;  %s1378_s21 = smov 0  }
   0x8   :  { %s1380_s22 = smov 0   ;;  %s1382_s23 = smov 0  }
   0x9   :  { %s1384_s24 = smov 0   ;;  %s1386_s25 = smov 0  }
   0xa LB: > { %1682 = sst [smem:[#allocation16_spill]] %s1286_s18  ;;  %s887_s26 = sadd.s32 4294967295, %s1314_s25   ;;  %s1314_s25 = sphi %s1386_s25, %s22_s25   ;;  %s1310_s24 = sphi %s1384_s24, %s1707_s24   ;;  %s1306_s23 = sphi %s1382_s23, %s1706_s23   ;;  %s1302_s22 = sphi %s1380_s22, %s1705_s22   ;;  %s1298_s21 = sphi %s1378_s21, %s1704_s21   ;;  %s1294_s20 = sphi %s1376_s20, %s1703_s20   ;;  %s1290_s19 = sphi %s1374_s19, %s1702_s19   ;;  %s1286_s18 = sphi %s1372_s18, %s1701_s18  }
   0xb   : > { %s888_s27 = sadd.s32 4294967294, %s1314_s25   ;;  %p54_p0 = scmp.ne.s32.totalorder %s1290_s19, %s1286_s18 }
   0xc   : > { %p1416_p1 = scmp.eq.s32.totalorder %s887_s26, 0  ;;  %p1420_p2 = scmp.eq.s32.totalorder %s887_s26, 7 }
   0xd   : > { %p168_p3 = scmp.eq.s32.totalorder %s888_s27, 7  ;;  %p889_p5 = scmp.ge.s32.totalorder %s1314_s25, 1 }
   0xe   : > { %s1683_s28 = scalar_select %p1416_p1, 1, 0 }
   0xf   : > { %s1684_s29 = scalar_select %p1420_p2, 1, 0 }
  0x10   : > { %p1426_p4 = por %p1416_p1, %p54_p0  ;;  %p1431_p6 = por %p168_p3, %p54_p0 }
  0x11   : > { %p175_p7 = scmp.lt.s32.totalorder %s1314_s25, 9  ;;  %s1316_s8 = smov [#allocation9]  }
  0x12   : > { %s1685_s30 = scalar_select %p1426_p4, 1, 0 }
  0x13   : > { %s1686_s6 = scalar_select %p1431_p6, 1, 0 }
  0x14   : > { %p1436_p8 = pnand %p889_p5, %p175_p7  ;;  %s187_s9 = sshll.u32 %s1316_s8, 4  ;;  %s188_s9 = int_to_ptr.vmem [resolvable:$true] %s187_s9 }
  0x15   : > { %1687 = sst [smem:[#allocation17_spill]] %s1686_s6  ;;  %s1317_s11 = smov [#allocation11]  }
  0x16   : > { %s1688_s7 = scalar_select %p1436_p8, 1, 0 }
  0x17   : > { %p1006_p9 = pneg %p1436_p8  ;;  %s203_s12 = sshll.u32 %s1317_s11, 4  ;;  %s1448_s12 = int_to_ptr.vmem [resolvable:$true] %s203_s12 }
  0x18   : > { %s1690_s1 = sld [smem:[#allocation18_spill]] }
  0x19   : > { %p1444_p10 = pnand %p1006_p9, %p1416_p1 }
  0x1b   : > { %p1128_p12 = pneg %p1444_p10 }
  0x1e   : > { %s1126_s15 = scalar_lea.hbm %s1690_s1, 256 }
  0x1f   : > { %p1127_p11 = scmp.ne.s32.totalorder %s1690_s1, %s1126_s15  ;;  %p1133_p3 = scmp.lt.u32.totalorder %s1126_s15, %s1690_s1 }
  0x21   : > { %p1129_p13 = pnand %p1128_p12, %p1127_p11 }
  0x23   : > { %p1130_p0 = pneg %p1129_p13 }
  0x25   : > { %p1135_p5 = pnand %p1133_p3, %p1130_p0 }
  0x27   : > { %1138 = shalt.err (!%p1135_p5)
}
  0x28   : > { %s1139_s8 = scalar_lea.vmem %s188_s9, 256  ;;  %p1147_p1 = scmp.lt.s32.totalorder %s188_s9, %s188_s9 }
  0x29   : > { %p1140_p7 = scmp.ne.s32.totalorder %s188_s9, %s1139_s8  ;;  %p1148_p4 = scmp.lt.s32.totalorder %s1139_s8, %s1139_s8 }
  0x2b   : > { %p1142_p9 = pnand %p1140_p7, %p1128_p12  ;;  %p1149_p8 = por %p1148_p4, %p1147_p1 }
  0x2d   : > { %p1143_p6 = pneg %p1142_p9 }
  0x2f   : > { %p1150_p2 = pnand %p1149_p8, %p1143_p6 }
  0x31   : > { %1153 = shalt.err (!%p1150_p2)
}
  0x32   : > { %s1318_s11 = smov 64   ;;  %s1319_s13 = smov 4  }
  0x33   : > { %1009 = dma.hbm_to_vmem [thread:$0]  (!%p1444_p10), %s1690_s1, 256, %s188_s9, [#allocation10], %s1318_s11, %s1318_s11, %s1319_s13  }
  0x34   : > { %s1154_s26 = scalar_lea.hbm %s1672_s3, 256 }
  0x35   : > { %p1155_p11 = scmp.ne.s32.totalorder %s1672_s3, %s1154_s26  ;;  %p1161_p4 = scmp.lt.u32.totalorder %s1154_s26, %s1672_s3 }
  0x37   : > { %p1157_p1 = pnand %p1155_p11, %p1128_p12 }
  0x39   : > { %p1158_p2 = pneg %p1157_p1 }
  0x3b   : > { %p1163_p6 = pnand %p1161_p4, %p1158_p2 }
  0x3d   : > { %1166 = shalt.err (!%p1163_p6)
}
  0x3e   : > { %s1167_s9 = scalar_lea.vmem %s1448_s12, 256  ;;  %p1175_p3 = scmp.lt.s32.totalorder %s1448_s12, %s1448_s12 }
  0x3f   : > { %p1168_p8 = scmp.ne.s32.totalorder %s1448_s12, %s1167_s9  ;;  %p1176_p5 = scmp.lt.s32.totalorder %s1167_s9, %s1167_s9 }
  0x41   : > { %p1170_p13 = pnand %p1168_p8, %p1128_p12  ;;  %p1177_p7 = por %p1176_p5, %p1175_p3 }
  0x43   : > { %p1171_p0 = pneg %p1170_p13 }
  0x45   : > { %p1178_p9 = pnand %p1177_p7, %p1171_p0 }
  0x47   : > { %1181 = shalt.err (!%p1178_p9)
}
  0x48   : > { %1012 = dma.hbm_to_vmem [thread:$0]  (!%p1444_p10), %s1672_s3, 256, %s1448_s12, [#allocation10], %s1318_s11, %s1318_s11, %s1319_s13  }
  0x49   : > { %s31_s14 = sadd.s32 1, %s1306_s23  ;;  %s34_s15 = sadd.s32 1, %s1310_s24 }
  0x4a   : > { %p32_p12 = scmp.ge.s32.totalorder %s31_s14, 4  ;;  %s41_s10 = sadd.s32 1, %s1294_s20 }
  0x4b   : > { %p48_p11 = scmp.ne.s32.totalorder %s1294_s20, %s1290_s19  ;;  %p49_p1 = scmp.eq.s32.totalorder %s1314_s25, 0 }
  0x4c   : > { %s1709_s14 = smov (%p32_p12, %s31_s14), 0  ;;  %s1711_s15 = smov (!%p32_p12, %s34_s15), %s1310_s24 }
  0x4d   : > { %p1506_p2 = por %p49_p1, %p48_p11  ;;  %p1692_p4 = scmp.ne.s32.totalorder %s1684_s29, 0 }
  0x4e   : > { %p36_p10 = scmp.ge.s32.totalorder %s1711_s15, 2  ;;  %p1023_p8 = scmp.lt.s32.totalorder %s1314_s25, 8 }
  0x4f   : > { %p1512_p6 = por %p1692_p4, %p48_p11  ;;  %s220_s12 = sand.u32 1, %s1294_s20  }
  0x50   : > { %s894_s11 = sshll.u32 %s1310_s24, 6  ;;  %s1713_s15 = smov (%p36_p10, %s1711_s15), 0 }
  0x51   : > { %s893_s13 = sshll.u32 %s220_s12, 2  ;;  %s38_s26 = ssub.s32 %s1310_s24, %s1713_s15 }
  0x52   : > { %p39_p13 = scmp.eq.s32.totalorder %s38_s26, 0  ;;  %s1526_s9 = scalar_lea.hbm %s1669_s0, %s894_s11 }
  0x53   : > { %s224_s29 = scalar_lea.vmem [#allocation6], %s893_s13  ;;  %p1530_p0 = pnand %p1023_p8, %p1506_p2 }
  0x54   : > { %s231_s18 = sshll.u32 %s224_s29, 4  ;;  %s221_s26 = scalar_lea.sflag [#allocation7], %s220_s12  ;;  %s1537_s18 = int_to_ptr.vmem [resolvable:$true] %s231_s18 }
  0x55   : > { %s1535_s1 = scalar_select %p39_p13, %s1294_s20, %s41_s10  }
  0x56   : > { %s1182_s11 = scalar_lea.hbm %s1526_s9, 64  ;;  %p1184_p5 = pneg %p1530_p0 }
  0x57   : > { %p1183_p3 = scmp.ne.s32.totalorder %s1526_s9, %s1182_s11  ;;  %s1187_s27 = scalar_lea.hbm %s1669_s0, 128 }
  0x58   : > { %p1188_p12 = scmp.lt.u32.totalorder %s1526_s9, %s1669_s0  ;;  %p1189_p11 = scmp.lt.u32.totalorder %s1187_s27, %s1182_s11 }
  0x59   : > { %p1185_p7 = pnand %p1184_p5, %p1183_p3  ;;  %p1191_p2 = scmp.lt.u32.totalorder %s1182_s11, %s1526_s9 }
  0x5a   : > { %p1190_p1 = por %p1189_p11, %p1188_p12 }
  0x5b   : > { %p1186_p9 = pneg %p1185_p7 }
  0x5c   : > { %p1192_p4 = por %p1191_p2, %p1190_p1 }
  0x5e   : > { %p1193_p10 = pnand %p1192_p4, %p1186_p9 }
  0x60   : > { %1196 = shalt.err (!%p1193_p10)
}
  0x61   : > { %s1197_s10 = scalar_lea.vmem %s1537_s18, 64  ;;  %s1320_s12 = smov [#allocation6]  }
  0x62   : > { %p1198_p8 = scmp.ne.s32.totalorder %s1537_s18, %s1197_s10  ;;  %s1202_s16 = sshll.u32 %s1320_s12, 4  ;;  %s1203_s16 = int_to_ptr.vmem [resolvable:$false] %s1202_s16 }
  0x63   : > { %s1204_s13 = scalar_lea.vmem %s1203_s16, 128  ;;  %p1205_p7 = scmp.lt.s32.totalorder %s1537_s18, %s1203_s16 }
  0x64   : > { %p1200_p13 = pnand %p1198_p8, %p1184_p5  ;;  %p1206_p12 = scmp.lt.s32.totalorder %s1204_s13, %s1197_s10 }
  0x66   : > { %p1201_p3 = pneg %p1200_p13  ;;  %p1207_p11 = por %p1206_p12, %p1205_p7 }
  0x68   : > { %p1208_p1 = pnand %p1207_p11, %p1201_p3 }
  0x6a   : > { %1211 = shalt.err (!%p1208_p1)
}
  0x6b   : > { %1016 = dma.hbm_to_vmem [thread:$0]  (!%p1530_p0), %s1526_s9, 64, %s1537_s18, %s221_s26  }
  0x6c   : > { %p1695_p9 = scmp.ne.s32.totalorder %s1688_s7, 0 }
  0x6d   : > { %s1567_s11 = sand.u32 (!%p1695_p9), 1, %s1290_s19   ;;  %p1696_p5 = scmp.ne.s32.totalorder (!%p1695_p9), %s1685_s30, 0 }
  0x6e   : > { %240 = sbr.rel (%p1695_p9) target bundleno = 1604 (0x644), region = 40  ;;  %s896_s27 = sshll.u32 (!%p1695_p9), %s1567_s11, 2 }
  0x6f   : > { %s243_s8 = scalar_lea.sflag (!%p1695_p9), [#allocation7], %s1567_s11  ;;  %s246_s29 = scalar_lea.vmem (!%p1695_p9), [#allocation6], %s896_s27 }
  0x75   : > { %1273 = dma.done.wait (%p1696_p5), %s243_s8, 64  }
  0x76   : > { %1275 = vsyncadd (%p1696_p5), %s243_s8, 4294967232  ;;  %p1697_p2 = scmp.ne.s32.totalorder %s1683_s28, 0 }
  0x78   : > { %1277 = dma.done.wait (%p1697_p2), [#allocation10], 512  }
  0x79   : > { %1279 = vsyncadd (%p1697_p2), [#allocation10], 4294966784  ;;  %s899_s7 = sshll.u32 %s1567_s11, 3  ;;  %p900_p0 = scmp.ne.s32.totalorder %s1298_s21, 0 }
  0x7a   : > { %s1580_s9 = scalar_lea.vmem [#allocation12], %s899_s7  ;;  %v1115_v0 = vld [vmem:[#allocation9] sm:$0xff] (!%p900_p0)   ;;  %v1321_v1 = vmov (!%p900_p0), 0.0   ;;  %v1116_v2 = vld [vmem:[#allocation9 + $0x8] sm:$0xff] (!%p900_p0)   ;;  %vm1322_vm0 = vmmov (!%p900_p0), 0   ;;  %vm303_vm1 = vcmask (!%p900_p0), 261120  }
  0x7b   : > { %285 = sbr.rel (%p900_p0) target bundleno = 483 (0x1e3), region = 56  ;;  %966 = vmatprep.subr.bf16.mxu0 (!%p900_p0), %v1321_v1  ;;  %970 = vmatprep.mubr.msk.bf16.mxu0 (!%p900_p0), %vm1322_vm0, %v1321_v1  ;;  %v286_v3 = vld [vmem:[%s246_s29] sm:$0xf] (!%p900_p0)  ;;  %vm356_vm2 = vcmask (!%p900_p0), 60416   ;;  %s1323_s18 = smov (!%p900_p0), 120  }
  0x7c   : > { %967 = vmatpush3.bf16.msra.mxu0 (!%p900_p0), %v1115_v0  ;;  %v904_v4 = vld [vmem:[%s1671_s2] ss:$0 sm:$0xff] (!%p900_p0)  ;;  %s1324_s6 = smov (!%p900_p0), 96   ;;  %s1325_s26 = smov (!%p900_p0), 88  }
  0x7d   : > { %968 = vmatprep.subr.bf16.mxu0 (!%p900_p0), %v1321_v1  ;;  %s1326_s10 = smov (!%p900_p0), 64   ;;  %s1327_s12 = smov (!%p900_p0), 112  }
  0x7e   : > { %s1328_s16 = smov (!%p900_p0), 56   ;;  %s1329_s13 = smov (!%p900_p0), 48  }
  0x7f   : > { %s1330_s27 = smov (!%p900_p0), 80   ;;  %s1331_s8 = smov (!%p900_p0), 72  }
  0x80   : > { %969 = vmatpush3.bf16.msra.mxu0 (!%p900_p0), %v1116_v2  ;;  %s1332_s29 = smov (!%p900_p0), 104   ;;  %s1333_s7 = smov (!%p900_p0), 40  }
  0x83   : > { %971 = vmatmul.mubr.msk.bf16.vlgmr.msra.gmra.mrb[0].mxu0 %vm303_vm1, %v286_v3 }
 0x156   : > { %v341_v5 = vpop.f32.mrb[0].mxu0 }
 0x157   : > { %v354_v6 = vadd.f32 %v904_v4, %v341_v5  ;;  %v972_v7 = vpop.f32.mrb[1].mxu0 }
 0x158   : > { %v344_v8 = vpop.f32.mrb[2].mxu0 }
 0x159   : > { %v355_v9 = vpack.c.bf16 %v354_v6, %v354_v6  ;;  %v973_v10 = vpop.f32.mrb[3].mxu0 }
 0x15b   : > { %402 = vrot.lane.b32.xlu1 %v355_v9, %s1323_s18  ;;  %370 = vrot.lane.b32.xlu0 %v355_v9, %s1324_s6  ;;  %357 = vst.msk [vmem:[#allocation2] sm:$0xf] %vm356_vm2, %v355_v9 }
 0x15f   : > { %419 = vrot.lane.b32.xlu1 %v355_v9, %s1325_s26  ;;  %386 = vrot.lane.b32.xlu0 %v355_v9, %s1326_s10 }
 0x163   : > { %453 = vrot.lane.b32.xlu1 %v355_v9, %s1327_s12  ;;  %436 = vrot.lane.b32.xlu0 %v355_v9, %s1328_s16 }
 0x167   : > { %487 = vrot.lane.b32.xlu1 %v355_v9, %s1329_s13  ;;  %470 = vrot.lane.b32.xlu0 %v355_v9, %s1330_s27 }
 0x16b   : > { %521 = vrot.lane.b32.xlu1 %v355_v9, %s1331_s8  ;;  %504 = vrot.lane.b32.xlu0 %v355_v9, %s1332_s29 }
 0x16f   : > { %538 = vrot.lane.b32.xlu0 %v355_v9, %s1333_s7 }
 0x1cd   : > { %v403_v11 = vpop.permute.xlu1 %402  ;;  %v371_v12 = vpop.permute.xlu0 %370 }
 0x1ce   : > { %406 = vst.msk [vmem:[#allocation2 + $0x4] sm:$0xf] %vm356_vm2, %v403_v11  ;;  %373 = vst.msk [vmem:[#allocation3] sm:$0xf] %vm356_vm2, %v371_v12 }
 0x1d1   : > { %v420_v13 = vpop.permute.xlu1 %419  ;;  %v387_v14 = vpop.permute.xlu0 %386 }
 0x1d2   : > { %423 = vst.msk [vmem:[#allocation3 + $0x4] sm:$0xf] %vm356_vm2, %v420_v13  ;;  %389 = vst.msk [vmem:[#allocation4] sm:$0xf] %vm356_vm2, %v387_v14 }
 0x1d5   : > { %v454_v15 = vpop.permute.xlu1 %453  ;;  %v437_v16 = vpop.permute.xlu0 %436 }
 0x1d6   : > { %457 = vst.msk [vmem:[#allocation2 + $0x8] sm:$0xf] %vm356_vm2, %v454_v15  ;;  %440 = vst.msk [vmem:[#allocation4 + $0x4] sm:$0xf] %vm356_vm2, %v437_v16 }
 0x1d9   : > { %v488_v17 = vpop.permute.xlu1 %487  ;;  %v471_v18 = vpop.permute.xlu0 %470 }
 0x1da   : > { %491 = vst.msk [vmem:[#allocation4 + $0x8] sm:$0xf] %vm356_vm2, %v488_v17  ;;  %474 = vst.msk [vmem:[#allocation3 + $0x8] sm:$0xf] %vm356_vm2, %v471_v18 }
 0x1dd   : > { %v522_v19 = vpop.permute.xlu1 %521  ;;  %v505_v20 = vpop.permute.xlu0 %504 }
 0x1de   : > { %525 = vst.msk [vmem:[#allocation3 + $0xc] sm:$0xf] %vm356_vm2, %v522_v19  ;;  %508 = vst.msk [vmem:[#allocation2 + $0xc] sm:$0xf] %vm356_vm2, %v505_v20 }
 0x1e1   : > { %v539_v21 = vpop.permute.xlu0 %538 }
 0x1e2   : > { %542 = vst.msk [vmem:[#allocation4 + $0xc] sm:$0xf] %vm356_vm2, %v539_v21 }
 0x1e3 PF: > { %s1599_s28 = sshll.u32 %s1298_s21, 2  ;;  %vm552_vm3 = vcmask 64512   ;;  %v1334_v22 = vmov 0.0   ;;  %vm1335_vm4 = vmmov 0   ;;  %vm614_vm5 = vcmask 1043456   ;;  %p933_p4 = scmp.ne.s32.totalorder %s1298_s21, 3 }
 0x1e4   : > { %974 = vmatprep.subr.bf16.mxu0 %v1334_v22  ;;  %976 = vmatprep.mubr.msk.bf16.mxu0 %vm1335_vm4, %v1334_v22  ;;  %s547_s30 = scalar_lea.vmem [#allocation3], %s1599_s28  ;;  %s544_s18 = scalar_lea.vmem [#allocation2], %s1599_s28  ;;  %vm661_vm6 = vcmask 60416   ;;  %v1337_v50 = vmov (!%p933_p4), 0.0   ;;  %v1124_v51 = vld [vmem:[#allocation11] sm:$0xff] (!%p933_p4)   ;;  %v1125_v52 = vld [vmem:[#allocation11 + $0x8] sm:$0xff] (!%p933_p4)  }
 0x1e5   : > { %v548_v23 = vld [vmem:[%s547_s30] sm:$0xf]  ;;  %980 = vmatprep.subr.bf16.mxu1 %v1334_v22  ;;  %982 = vmatprep.mubr.msk.bf16.mxu1 %vm1335_vm4, %v1334_v22  ;;  %s550_s6 = scalar_lea.vmem [#allocation4], %s1599_s28  ;;  %s660_s26 = scalar_lea.vmem [#allocation5], %s1599_s28  ;;  %vm1340_vm7 = vmmov (!%p933_p4), 0   ;;  %vm692_vm8 = vcmask (!%p933_p4), 130048  }
 0x1e6   : > { %v557_v24 = vsel %vm552_vm3, %v548_v23, 0  ;;  %v545_v25 = vld [vmem:[%s544_s18] sm:$0xf]  ;;  %s1336_s10 = smov (!%p933_p4), 8   ;;  %s1338_s12 = smov (!%p933_p4), 24   ;;  %vm695_vm9 = vcmask (!%p933_p4), 195584  }
 0x1e7   : > { %975 = vmatpush3.bf16.xpose.msra.mxu0 %v557_v24  ;;  %s1339_s16 = smov (!%p933_p4), 16   ;;  %vm721_vm10 = vcmask (!%p933_p4), 261120   ;;  %v937_v60 = vld [vmem:[%s1673_s4] ss:$0 sm:$0xff] (!%p933_p4) }
 0x1e8   : > { %986 = vmatprep.subr.bf16.mxu0 (!%p933_p4), %v1337_v50 }
 0x1e9   : > { %v551_v36 = vld [vmem:[%s550_s6] sm:$0xf] }
 0x1ea   : > { %v616_v37 = vsel %vm614_vm5, %v551_v36, 0 }
 0x1eb   : > { %981 = vmatpush3.bf16.msra.mxu1 %v616_v37 }
 0x1ee   : > { %977 = vmatmul.mubr.msk.bf16.vlgmr.msra.gmra.mrb[0].mxu0 %vm552_vm3, %v545_v25 }
 0x1ef   : > { %987 = vmatpush3.bf16.msra.mxu0 (!%p933_p4), %v1124_v51  ;;  %990 = vmatprep.mubr.msk.bf16.mxu0 (!%p933_p4), %vm1340_vm7, %v1337_v50 }
 0x1f0   : > { %988 = vmatprep.subr.bf16.mxu0 (!%p933_p4), %v1337_v50 }
 0x1f3   : > { %989 = vmatpush3.bf16.msra.mxu0 (!%p933_p4), %v1125_v52 }
 0x2c1   : > { %v593_v26 = vpop.f32.mrb[0].mxu0 }
 0x2c2   : > { %v978_v27 = vpop.f32.mrb[1].mxu0  ;;  %v599_v28 = vsel %vm552_vm3, %v593_v26, -inf }
 0x2c3   : > { %600 = vmax.xlane.f32.xlu0 %v599_v28  ;;  %v596_v29 = vpop.f32.mrb[2].mxu0 }
 0x2c4   : > { %v979_v30 = vpop.f32.mrb[3].mxu0 }
 0x350   : > { %v601_v31 = vpop.xlane.xlu0 %600 }
 0x351   : > { %v602_v32 = vsub.f32 %v593_v26, %v601_v31 }
 0x353   : > { %v603_v33 = vmul.f32 1.442695, %v602_v32 }
 0x355   : > { %1117 = vpow2.f32 %v603_v33 }
 0x35f   : > { %v1118_v34 = vpop.eup %1117 }
 0x360   : > { %v605_v35 = vsel %vm552_vm3, %v1118_v34, 0.0 }
 0x361   : > { %606 = vadd.xlane.f32.xlu0 %v605_v35 }
 0x3ee   : > { %v607_v38 = vpop.xlane.xlu0 %606 }
 0x3ef   : > { %1119 = vrcp.f32 %v607_v38 }
 0x3f9   : > { %v1120_v39 = vpop.eup %1119 }
 0x3fa   : > { %v609_v40 = vmul.f32 %v1120_v39, %v1118_v34 }
 0x3fc   : > { %v610_v41 = vpack.c.bf16 %v609_v40, %v609_v40 }
 0x3fe   : > { %983 = vmatmul.mubr.msk.bf16.vlgmr.msra.gmra.mrb[0].mxu1 %vm552_vm3, %v610_v41 }
 0x4ce   : > { %666 = sbr.rel (%p933_p4) target bundleno = 1580 (0x62c), region = 60 }
 0x4d1   : > { %v652_v42 = vpop.f32.mrb[0].mxu1 }
 0x4d2   : > { %v658_v43 = vpack.c.bf16 %v652_v42, %v652_v42  ;;  %v984_v44 = vpop.f32.mrb[1].mxu1 }
 0x4d3   : > { %v655_v45 = vpop.f32.mrb[2].mxu1 }
 0x4d4   : > { %662 = vst.msk [vmem:[%s660_s26] sm:$0xf] %vm661_vm6, %v658_v43  ;;  %v985_v46 = vpop.f32.mrb[3].mxu1 }
 0x4db   : > { %v1121_v47 = vld [vmem:[#allocation5 + $0x4] ss:$0 sps:$4 sm:$0xff]   ;;  %v1122_v48 = vld [vmem:[#allocation5 + $0x8] ss:$0 sps:$4 sm:$0xff]   ;;  %v1123_v49 = vld [vmem:[#allocation5 + $0xc] ss:$0 sps:$4 sm:$0xff]  }
 0x4dc   : > { %677 = vrot.lane.b32.xlu0 %v1121_v47, %s1336_s10  ;;  %687 = vrot.lane.b32.xlu1 %v1123_v49, %s1338_s12  ;;  %v667_v54 = vld [vmem:[#allocation5] sm:$0xf] }
 0x4e0   : > { %682 = vrot.lane.b32.xlu0 %v1122_v48, %s1339_s16 }
 0x54e   : > { %v678_v53 = vpop.permute.xlu0 %677  ;;  %v688_v55 = vpop.permute.xlu1 %687 }
 0x54f   : > { %v691_v56 = vsel %vm552_vm3, %v667_v54, %v678_v53 }
 0x552   : > { %v683_v57 = vpop.permute.xlu0 %682 }
 0x553   : > { %v694_v58 = vsel %vm692_vm8, %v691_v56, %v683_v57 }
 0x554   : > { %v697_v59 = vsel %vm695_vm9, %v694_v58, %v688_v55 }
 0x555   : > { %991 = vmatmul.mubr.msk.bf16.vlgmr.msra.gmra.mrb[0].mxu0 %vm721_vm10, %v697_v59 }
 0x628   : > { %v758_v61 = vpop.f32.mrb[0].mxu0 }
 0x629   : > { %v759_v62 = vadd.f32 %v937_v60, %v758_v61  ;;  %v992_v63 = vpop.f32.mrb[1].mxu0 }
 0x62a   : > { %v761_v0 = vpop.f32.mrb[2].mxu0 }
 0x62b   : > { %764 = vst.msk [vmem:[%s1580_s9] sm:$0xff] %vm721_vm10, %v759_v62  ;;  %v993_v1 = vpop.f32.mrb[3].mxu0 }
 0x62c PF: > { %s942_s27 = sshll.u32 %s1302_s22, 7  ;;  %s779_s28 = sshll.u32 %s1580_s9, 4  ;;  %s780_s28 = int_to_ptr.vmem [resolvable:$true] %s779_s28 }
 0x62d   : > { %s1620_s7 = scalar_lea.hbm %s1674_s5, %s942_s27  ;;  %s766_s30 = scalar_lea.sflag [#allocation8], %s1567_s11 }
 0x62e   : > { %s1212_s18 = scalar_lea.vmem %s780_s28, 128  ;;  %s1341_s6 = smov [#allocation12]  }
 0x62f   : > { %p1213_p10 = scmp.ne.s32.totalorder %s780_s28, %s1212_s18  ;;  %s1216_s26 = sshll.u32 %s1341_s6, 4  ;;  %s1217_s26 = int_to_ptr.vmem [resolvable:$false] %s1216_s26 }
 0x630   : > { %s1218_s10 = scalar_lea.vmem %s1217_s26, 256  ;;  %p1219_p3 = scmp.lt.s32.totalorder %s780_s28, %s1217_s26 }
 0x631   : > { %p1214_p8 = pnand %p1213_p10, %p1512_p6  ;;  %p1220_p7 = scmp.lt.s32.totalorder %s1218_s10, %s1212_s18 }
 0x633   : > { %p1215_p13 = pneg %p1214_p8  ;;  %p1221_p12 = por %p1220_p7, %p1219_p3 }
 0x635   : > { %p1222_p11 = pnand %p1221_p12, %p1215_p13 }
 0x637   : > { %1225 = shalt.err (!%p1222_p11)
}
 0x638   : > { %s1226_s22 = scalar_lea.hbm %s1620_s7, 128  ;;  %s1230_s12 = scalar_lea.hbm %s1674_s5, 256 }
 0x639   : > { %p1227_p1 = scmp.ne.s32.totalorder %s1620_s7, %s1226_s22  ;;  %p1231_p2 = scmp.lt.u32.totalorder %s1620_s7, %s1674_s5 }
 0x63a   : > { %p1232_p0 = scmp.lt.u32.totalorder %s1230_s12, %s1226_s22  ;;  %p1234_p10 = scmp.lt.u32.totalorder %s1226_s22, %s1620_s7 }
 0x63b   : > { %p1228_p9 = pnand %p1227_p1, %p1512_p6 }
 0x63c   : > { %p1233_p4 = por %p1232_p0, %p1231_p2 }
 0x63d   : > { %p1229_p5 = pneg %p1228_p9 }
 0x63e   : > { %p1235_p8 = por %p1234_p10, %p1233_p4 }
 0x640   : > { %p1236_p13 = pnand %p1235_p8, %p1229_p5 }
 0x642   : > { %1239 = shalt.err (!%p1236_p13)
}
 0x643   : > { %1004 = dma.vmem_to_hbm [thread:$0]  (%p1512_p6), %s780_s28, 128, %s1620_s7, %s766_s30  }
 0x644 PF: > { %s1698_s13 = sld [smem:[#allocation16_spill]]  ;;  %s1699_s27 = sld [smem:[#allocation17_spill]] }
 0x645   : > { %p1026_p3 = scmp.ge.s32.totalorder %s1314_s25, 2 }
 0x64a   : > { %s791_s8 = sand.u32 1, %s1698_s13   ;;  %p1700_p7 = scmp.ne.s32.totalorder %s1699_s27, 0 }
 0x64b   : > { %s792_s29 = scalar_lea.sflag [#allocation8], %s791_s8 }
 0x64c   : > { %p1018_p12 = pnand %p1026_p3, %p1700_p7 }
 0x64e   : > { %1281 = dma.done.wait (!%p1018_p12), %s792_s29, 128  }
 0x64f   : > { %1283 = vsyncadd (!%p1018_p12), %s792_s29, 4294967168  ;;  %s22_s25 = sadd.s32 1, %s1314_s25   ;;  %s1701_s18 = smov %s1290_s19 }
 0x650   : > { %p19_p11 = scmp.ge.s32.totalorder %s22_s25, 10   ;;  %s1702_s19 = smov %s1294_s20 }
 0x651   : > { %s1703_s20 = smov %s1535_s1  ;;  %s1704_s21 = smov %s1306_s23 }
 0x652   : > { %s1705_s22 = smov %s1310_s24  ;;  %s1706_s23 = smov %s1709_s14 }
 0x653   : > { %s1707_s24 = smov %s1713_s15  ;;  %21 = sbr.rel (!%p19_p11) target bundleno = 10 (0xa), region = 117 }
 0x65a   :  { %797 = vsyncpa [#allocation7], 1 }
 0x65b   :  { %799 = vsyncpa [#allocation7 + $0x1], 1 }
 0x65c   :  { %800 = vsyncpa [#allocation10], 1 }
 0x65d   :  { %801 = vsyncpa [#allocation8], 1 }
 0x65e   :  { %803 = vsyncpa [#allocation8 + $0x1], 1 }

// kernel: tpu_custom_call.1
= control target key start
LH: loop header
LB: loop body
LE: loop exit
PB: predicated region body
PF: predicated region fallthrough
CT: control target
= control target key end

     0   :  { %s1669_s0 = inlined_call_operand.hbm [shape: bf16[2,8,32], index: 0, kind: input, shape index: {}]   ;;  %s1670_s1 = inlined_call_operand.hbm [shape: bf16[32,96], index: 1, kind: input, shape index: {}]   ;;  %s1671_s2 = inlined_call_operand.vmem [shape: f32[1,96], index: 2, kind: input, shape index: {}]   ;;  %s1672_s3 = inlined_call_operand.hbm [shape: bf16[32,32], index: 3, kind: input, shape index: {}]   ;;  %s1673_s4 = inlined_call_operand.vmem [shape: f32[1,32], index: 4, kind: input, shape index: {}]   ;;  %s1674_s5 = inlined_call_operand.hbm [shape: f32[2,8,32], index: 5, kind: output, shape index: {}]  }
   0x1   :  { %1681 = sst [smem:[#allocation18_spill]] %s1670_s1 }
   0x2   :  { %10 = vsyncpa [#allocation7], 0 }
   0x3   :  { %12 = vsyncpa [#allocation7 + $0x1], 0 }
   0x4   :  { %13 = vsyncpa [#allocation10], 0 }
   0x5   :  { %14 = vsyncpa [#allocation8], 0 }
   0x6   :  { %16 = vsyncpa [#allocation8 + $0x1], 0  ;;  %s1372_s18 = smov 0   ;;  %s1374_s19 = smov 0  }
   0x7   :  { %s1376_s20 = smov 0   ;;  %s1378_s21 = smov 0  }
   0x8   :  { %s1380_s22 = smov 0   ;;  %s1382_s23 = smov 0  }
   0x9   :  { %s1384_s24 = smov 0   ;;  %s1386_s25 = smov 0  }
   0xa LB: > { %1682 = sst [smem:[#allocation16_spill]] %s1286_s18  ;;  %s887_s26 = sadd.s32 4294967295, %s1314_s25   ;;  %s1314_s25 = sphi %s1386_s25, %s22_s25   ;;  %s1310_s24 = sphi %s1384_s24, %s1707_s24   ;;  %s1306_s23 = sphi %s1382_s23, %s1706_s23   ;;  %s1302_s22 = sphi %s1380_s22, %s1705_s22   ;;  %s1298_s21 = sphi %s1378_s21, %s1704_s21   ;;  %s1294_s20 = sphi %s1376_s20, %s1703_s20   ;;  %s1290_s19 = sphi %s1374_s19, %s1702_s19   ;;  %s1286_s18 = sphi %s1372_s18, %s1701_s18  }
   0xb   : > { %s888_s27 = sadd.s32 4294967294, %s1314_s25   ;;  %p54_p0 = scmp.ne.s32.totalorder %s1290_s19, %s1286_s18 }
   0xc   : > { %p1416_p1 = scmp.eq.s32.totalorder %s887_s26, 0  ;;  %p1420_p2 = scmp.eq.s32.totalorder %s887_s26, 7 }
   0xd   : > { %p168_p3 = scmp.eq.s32.totalorder %s888_s27, 7  ;;  %p889_p5 = scmp.ge.s32.totalorder %s1314_s25, 1 }
   0xe   : > { %s1683_s28 = scalar_select %p1416_p1, 1, 0 }
   0xf   : > { %s1684_s29 = scalar_select %p1420_p2, 1, 0 }
  0x10   : > { %p1426_p4 = por %p1416_p1, %p54_p0  ;;  %p1431_p6 = por %p168_p3, %p54_p0 }
  0x11   : > { %p175_p7 = scmp.lt.s32.totalorder %s1314_s25, 9  ;;  %s1316_s8 = smov [#allocation9]  }
  0x12   : > { %s1685_s30 = scalar_select %p1426_p4, 1, 0 }
  0x13   : > { %s1686_s6 = scalar_select %p1431_p6, 1, 0 }
  0x14   : > { %p1436_p8 = pnand %p889_p5, %p175_p7  ;;  %s187_s9 = sshll.u32 %s1316_s8, 4  ;;  %s188_s9 = int_to_ptr.vmem [resolvable:$true] %s187_s9 }
  0x15   : > { %1687 = sst [smem:[#allocation17_spill]] %s1686_s6  ;;  %s1317_s11 = smov [#allocation11]  }
  0x16   : > { %s1688_s7 = scalar_select %p1436_p8, 1, 0 }
  0x17   : > { %p1006_p9 = pneg %p1436_p8  ;;  %s203_s12 = sshll.u32 %s1317_s11, 4  ;;  %s1448_s12 = int_to_ptr.vmem [resolvable:$true] %s203_s12 }
  0x18   : > { %s1690_s1 = sld [smem:[#allocation18_spill]] }
  0x19   : > { %p1444_p10 = pnand %p1006_p9, %p1416_p1 }
  0x1b   : > { %p1128_p12 = pneg %p1444_p10 }
  0x1e   : > { %s1126_s15 = scalar_lea.hbm %s1690_s1, 256 }
  0x1f   : > { %p1127_p11 = scmp.ne.s32.totalorder %s1690_s1, %s1126_s15  ;;  %p1133_p3 = scmp.lt.u32.totalorder %s1126_s15, %s1690_s1 }
  0x21   : > { %p1129_p13 = pnand %p1128_p12, %p1127_p11 }
  0x23   : > { %p1130_p0 = pneg %p1129_p13 }
  0x25   : > { %p1135_p5 = pnand %p1133_p3, %p1130_p0 }
  0x27   : > { %1138 = shalt.err (!%p1135_p5)
}
  0x28   : > { %s1139_s8 = scalar_lea.vmem %s188_s9, 256  ;;  %p1147_p1 = scmp.lt.s32.totalorder %s188_s9, %s188_s9 }
  0x29   : > { %p1140_p7 = scmp.ne.s32.totalorder %s188_s9, %s1139_s8  ;;  %p1148_p4 = scmp.lt.s32.totalorder %s1139_s8, %s1139_s8 }
  0x2b   : > { %p1142_p9 = pnand %p1140_p7, %p1128_p12  ;;  %p1149_p8 = por %p1148_p4, %p1147_p1 }
  0x2d   : > { %p1143_p6 = pneg %p1142_p9 }
  0x2f   : > { %p1150_p2 = pnand %p1149_p8, %p1143_p6 }
  0x31   : > { %1153 = shalt.err (!%p1150_p2)
}
  0x32   : > { %s1318_s11 = smov 64   ;;  %s1319_s13 = smov 4  }
  0x33   : > { %1009 = dma.hbm_to_vmem [thread:$0]  (!%p1444_p10), %s1690_s1, 256, %s188_s9, [#allocation10], %s1318_s11, %s1318_s11, %s1319_s13  }
  0x34   : > { %s1154_s26 = scalar_lea.hbm %s1672_s3, 256 }
  0x35   : > { %p1155_p11 = scmp.ne.s32.totalorder %s1672_s3, %s1154_s26  ;;  %p1161_p4 = scmp.lt.u32.totalorder %s1154_s26, %s1672_s3 }
  0x37   : > { %p1157_p1 = pnand %p1155_p11, %p1128_p12 }
  0x39   : > { %p1158_p2 = pneg %p1157_p1 }
  0x3b   : > { %p1163_p6 = pnand %p1161_p4, %p1158_p2 }
  0x3d   : > { %1166 = shalt.err (!%p1163_p6)
}
  0x3e   : > { %s1167_s9 = scalar_lea.vmem %s1448_s12, 256  ;;  %p1175_p3 = scmp.lt.s32.totalorder %s1448_s12, %s1448_s12 }
  0x3f   : > { %p1168_p8 = scmp.ne.s32.totalorder %s1448_s12, %s1167_s9  ;;  %p1176_p5 = scmp.lt.s32.totalorder %s1167_s9, %s1167_s9 }
  0x41   : > { %p1170_p13 = pnand %p1168_p8, %p1128_p12  ;;  %p1177_p7 = por %p1176_p5, %p1175_p3 }
  0x43   : > { %p1171_p0 = pneg %p1170_p13 }
  0x45   : > { %p1178_p9 = pnand %p1177_p7, %p1171_p0 }
  0x47   : > { %1181 = shalt.err (!%p1178_p9)
}
  0x48   : > { %1012 = dma.hbm_to_vmem [thread:$0]  (!%p1444_p10), %s1672_s3, 256, %s1448_s12, [#allocation10], %s1318_s11, %s1318_s11, %s1319_s13  }
  0x49   : > { %s31_s14 = sadd.s32 1, %s1306_s23  ;;  %s34_s15 = sadd.s32 1, %s1310_s24 }
  0x4a   : > { %p32_p12 = scmp.ge.s32.totalorder %s31_s14, 4  ;;  %s41_s10 = sadd.s32 1, %s1294_s20 }
  0x4b   : > { %p48_p11 = scmp.ne.s32.totalorder %s1294_s20, %s1290_s19  ;;  %p49_p1 = scmp.eq.s32.totalorder %s1314_s25, 0 }
  0x4c   : > { %s1709_s14 = smov (%p32_p12, %s31_s14), 0  ;;  %s1711_s15 = smov (!%p32_p12, %s34_s15), %s1310_s24 }
  0x4d   : > { %p1506_p2 = por %p49_p1, %p48_p11  ;;  %p1692_p4 = scmp.ne.s32.totalorder %s1684_s29, 0 }
  0x4e   : > { %p36_p10 = scmp.ge.s32.totalorder %s1711_s15, 2  ;;  %p1023_p8 = scmp.lt.s32.totalorder %s1314_s25, 8 }
  0x4f   : > { %p1512_p6 = por %p1692_p4, %p48_p11  ;;  %s220_s12 = sand.u32 1, %s1294_s20  }
  0x50   : > { %s894_s11 = sshll.u32 %s1310_s24, 6  ;;  %s1713_s15 = smov (%p36_p10, %s1711_s15), 0 }
  0x51   : > { %s893_s13 = sshll.u32 %s220_s12, 2  ;;  %s38_s26 = ssub.s32 %s1310_s24, %s1713_s15 }
  0x52   : > { %p39_p13 = scmp.eq.s32.totalorder %s38_s26, 0  ;;  %s1526_s9 = scalar_lea.hbm %s1669_s0, %s894_s11 }
  0x53   : > { %s224_s29 = scalar_lea.vmem [#allocation6], %s893_s13  ;;  %p1530_p0 = pnand %p1023_p8, %p1506_p2 }
  0x54   : > { %s231_s18 = sshll.u32 %s224_s29, 4  ;;  %s221_s26 = scalar_lea.sflag [#allocation7], %s220_s12  ;;  %s1537_s18 = int_to_ptr.vmem [resolvable:$true] %s231_s18 }
  0x55   : > { %s1535_s1 = scalar_select %p39_p13, %s1294_s20, %s41_s10  }
  0x56   : > { %s1182_s11 = scalar_lea.hbm %s1526_s9, 64  ;;  %p1184_p5 = pneg %p1530_p0 }
  0x57   : > { %p1183_p3 = scmp.ne.s32.totalorder %s1526_s9, %s1182_s11  ;;  %s1187_s27 = scalar_lea.hbm %s1669_s0, 128 }
  0x58   : > { %p1188_p12 = scmp.lt.u32.totalorder %s1526_s9, %s1669_s0  ;;  %p1189_p11 = scmp.lt.u32.totalorder %s1187_s27, %s1182_s11 }
  0x59   : > { %p1185_p7 = pnand %p1184_p5, %p1183_p3  ;;  %p1191_p2 = scmp.lt.u32.totalorder %s1182_s11, %s1526_s9 }
  0x5a   : > { %p1190_p1 = por %p1189_p11, %p1188_p12 }
  0x5b   : > { %p1186_p9 = pneg %p1185_p7 }
  0x5c   : > { %p1192_p4 = por %p1191_p2, %p1190_p1 }
  0x5e   : > { %p1193_p10 = pnand %p1192_p4, %p1186_p9 }
  0x60   : > { %1196 = shalt.err (!%p1193_p10)
}
  0x61   : > { %s1197_s10 = scalar_lea.vmem %s1537_s18, 64  ;;  %s1320_s12 = smov [#allocation6]  }
  0x62   : > { %p1198_p8 = scmp.ne.s32.totalorder %s1537_s18, %s1197_s10  ;;  %s1202_s16 = sshll.u32 %s1320_s12, 4  ;;  %s1203_s16 = int_to_ptr.vmem [resolvable:$false] %s1202_s16 }
  0x63   : > { %s1204_s13 = scalar_lea.vmem %s1203_s16, 128  ;;  %p1205_p7 = scmp.lt.s32.totalorder %s1537_s18, %s1203_s16 }
  0x64   : > { %p1200_p13 = pnand %p1198_p8, %p1184_p5  ;;  %p1206_p12 = scmp.lt.s32.totalorder %s1204_s13, %s1197_s10 }
  0x66   : > { %p1201_p3 = pneg %p1200_p13  ;;  %p1207_p11 = por %p1206_p12, %p1205_p7 }
  0x68   : > { %p1208_p1 = pnand %p1207_p11, %p1201_p3 }
  0x6a   : > { %1211 = shalt.err (!%p1208_p1)
}
  0x6b   : > { %1016 = dma.hbm_to_vmem [thread:$0]  (!%p1530_p0), %s1526_s9, 64, %s1537_s18, %s221_s26  }
  0x6c   : > { %p1695_p9 = scmp.ne.s32.totalorder %s1688_s7, 0 }
  0x6d   : > { %s1567_s11 = sand.u32 (!%p1695_p9), 1, %s1290_s19   ;;  %p1696_p5 = scmp.ne.s32.totalorder (!%p1695_p9), %s1685_s30, 0 }
  0x6e   : > { %240 = sbr.rel (%p1695_p9) target bundleno = 1604 (0x644), region = 40  ;;  %s896_s27 = sshll.u32 (!%p1695_p9), %s1567_s11, 2 }
  0x6f   : > { %s243_s8 = scalar_lea.sflag (!%p1695_p9), [#allocation7], %s1567_s11  ;;  %s246_s29 = scalar_lea.vmem (!%p1695_p9), [#allocation6], %s896_s27 }
  0x75   : > { %1273 = dma.done.wait (%p1696_p5), %s243_s8, 64  }
  0x76   : > { %1275 = vsyncadd (%p1696_p5), %s243_s8, 4294967232  ;;  %p1697_p2 = scmp.ne.s32.totalorder %s1683_s28, 0 }
  0x78   : > { %1277 = dma.done.wait (%p1697_p2), [#allocation10], 512  }
  0x79   : > { %1279 = vsyncadd (%p1697_p2), [#allocation10], 4294966784  ;;  %s899_s7 = sshll.u32 %s1567_s11, 3  ;;  %p900_p0 = scmp.ne.s32.totalorder %s1298_s21, 0 }
  0x7a   : > { %s1580_s9 = scalar_lea.vmem [#allocation12], %s899_s7  ;;  %v1115_v0 = vld [vmem:[#allocation9] sm:$0xff] (!%p900_p0)   ;;  %v1321_v1 = vmov (!%p900_p0), 0.0   ;;  %v1116_v2 = vld [vmem:[#allocation9 + $0x8] sm:$0xff] (!%p900_p0)   ;;  %vm1322_vm0 = vmmov (!%p900_p0), 0   ;;  %vm303_vm1 = vcmask (!%p900_p0), 261120  }
  0x7b   : > { %285 = sbr.rel (%p900_p0) target bundleno = 483 (0x1e3), region = 56  ;;  %966 = vmatprep.subr.bf16.mxu0 (!%p900_p0), %v1321_v1  ;;  %970 = vmatprep.mubr.msk.bf16.mxu0 (!%p900_p0), %vm1322_vm0, %v1321_v1  ;;  %v286_v3 = vld [vmem:[%s246_s29] sm:$0xf] (!%p900_p0)  ;;  %vm356_vm2 = vcmask (!%p900_p0), 60416   ;;  %s1323_s18 = smov (!%p900_p0), 120  }
  0x7c   : > { %967 = vmatpush3.bf16.msra.mxu0 (!%p900_p0), %v1115_v0  ;;  %v904_v4 = vld [vmem:[%s1671_s2] ss:$0 sm:$0xff] (!%p900_p0)  ;;  %s1324_s6 = smov (!%p900_p0), 96   ;;  %s1325_s26 = smov (!%p900_p0), 88  }
  0x7d   : > { %968 = vmatprep.subr.bf16.mxu0 (!%p900_p0), %v1321_v1  ;;  %s1326_s10 = smov (!%p900_p0), 64   ;;  %s1327_s12 = smov (!%p900_p0), 112  }
  0x7e   : > { %s1328_s16 = smov (!%p900_p0), 56   ;;  %s1329_s13 = smov (!%p900_p0), 48  }
  0x7f   : > { %s1330_s27 = smov (!%p900_p0), 80   ;;  %s1331_s8 = smov (!%p900_p0), 72  }
  0x80   : > { %969 = vmatpush3.bf16.msra.mxu0 (!%p900_p0), %v1116_v2  ;;  %s1332_s29 = smov (!%p900_p0), 104   ;;  %s1333_s7 = smov (!%p900_p0), 40  }
  0x83   : > { %971 = vmatmul.mubr.msk.bf16.vlgmr.msra.gmra.mrb[0].mxu0 %vm303_vm1, %v286_v3 }
 0x156   : > { %v341_v5 = vpop.f32.mrb[0].mxu0 }
 0x157   : > { %v354_v6 = vadd.f32 %v904_v4, %v341_v5  ;;  %v972_v7 = vpop.f32.mrb[1].mxu0 }
 0x158   : > { %v344_v8 = vpop.f32.mrb[2].mxu0 }
 0x159   : > { %v355_v9 = vpack.c.bf16 %v354_v6, %v354_v6  ;;  %v973_v10 = vpop.f32.mrb[3].mxu0 }
 0x15b   : > { %402 = vrot.lane.b32.xlu1 %v355_v9, %s1323_s18  ;;  %370 = vrot.lane.b32.xlu0 %v355_v9, %s1324_s6  ;;  %357 = vst.msk [vmem:[#allocation2] sm:$0xf] %vm356_vm2, %v355_v9 }
 0x15f   : > { %419 = vrot.lane.b32.xlu1 %v355_v9, %s1325_s26  ;;  %386 = vrot.lane.b32.xlu0 %v355_v9, %s1326_s10 }
 0x163   : > { %453 = vrot.lane.b32.xlu1 %v355_v9, %s1327_s12  ;;  %436 = vrot.lane.b32.xlu0 %v355_v9, %s1328_s16 }
 0x167   : > { %487 = vrot.lane.b32.xlu1 %v355_v9, %s1329_s13  ;;  %470 = vrot.lane.b32.xlu0 %v355_v9, %s1330_s27 }
 0x16b   : > { %521 = vrot.lane.b32.xlu1 %v355_v9, %s1331_s8  ;;  %504 = vrot.lane.b32.xlu0 %v355_v9, %s1332_s29 }
 0x16f   : > { %538 = vrot.lane.b32.xlu0 %v355_v9, %s1333_s7 }
 0x1cd   : > { %v403_v11 = vpop.permute.xlu1 %402  ;;  %v371_v12 = vpop.permute.xlu0 %370 }
 0x1ce   : > { %406 = vst.msk [vmem:[#allocation2 + $0x4] sm:$0xf] %vm356_vm2, %v403_v11  ;;  %373 = vst.msk [vmem:[#allocation3] sm:$0xf] %vm356_vm2, %v371_v12 }
 0x1d1   : > { %v420_v13 = vpop.permute.xlu1 %419  ;;  %v387_v14 = vpop.permute.xlu0 %386 }
 0x1d2   : > { %423 = vst.msk [vmem:[#allocation3 + $0x4] sm:$0xf] %vm356_vm2, %v420_v13  ;;  %389 = vst.msk [vmem:[#allocation4] sm:$0xf] %vm356_vm2, %v387_v14 }
 0x1d5   : > { %v454_v15 = vpop.permute.xlu1 %453  ;;  %v437_v16 = vpop.permute.xlu0 %436 }
 0x1d6   : > { %457 = vst.msk [vmem:[#allocation2 + $0x8] sm:$0xf] %vm356_vm2, %v454_v15  ;;  %440 = vst.msk [vmem:[#allocation4 + $0x4] sm:$0xf] %vm356_vm2, %v437_v16 }
 0x1d9   : > { %v488_v17 = vpop.permute.xlu1 %487  ;;  %v471_v18 = vpop.permute.xlu0 %470 }
 0x1da   : > { %491 = vst.msk [vmem:[#allocation4 + $0x8] sm:$0xf] %vm356_vm2, %v488_v17  ;;  %474 = vst.msk [vmem:[#allocation3 + $0x8] sm:$0xf] %vm356_vm2, %v471_v18 }
 0x1dd   : > { %v522_v19 = vpop.permute.xlu1 %521  ;;  %v505_v20 = vpop.permute.xlu0 %504 }
 0x1de   : > { %525 = vst.msk [vmem:[#allocation3 + $0xc] sm:$0xf] %vm356_vm2, %v522_v19  ;;  %508 = vst.msk [vmem:[#allocation2 + $0xc] sm:$0xf] %vm356_vm2, %v505_v20 }
 0x1e1   : > { %v539_v21 = vpop.permute.xlu0 %538 }
 0x1e2   : > { %542 = vst.msk [vmem:[#allocation4 + $0xc] sm:$0xf] %vm356_vm2, %v539_v21 }
 0x1e3 PF: > { %s1599_s28 = sshll.u32 %s1298_s21, 2  ;;  %vm552_vm3 = vcmask 64512   ;;  %v1334_v22 = vmov 0.0   ;;  %vm1335_vm4 = vmmov 0   ;;  %vm614_vm5 = vcmask 1043456   ;;  %p933_p4 = scmp.ne.s32.totalorder %s1298_s21, 3 }
 0x1e4   : > { %974 = vmatprep.subr.bf16.mxu0 %v1334_v22  ;;  %976 = vmatprep.mubr.msk.bf16.mxu0 %vm1335_vm4, %v1334_v22  ;;  %s547_s30 = scalar_lea.vmem [#allocation3], %s1599_s28  ;;  %s544_s18 = scalar_lea.vmem [#allocation2], %s1599_s28  ;;  %vm661_vm6 = vcmask 60416   ;;  %v1337_v50 = vmov (!%p933_p4), 0.0   ;;  %v1124_v51 = vld [vmem:[#allocation11] sm:$0xff] (!%p933_p4)   ;;  %v1125_v52 = vld [vmem:[#allocation11 + $0x8] sm:$0xff] (!%p933_p4)  }
 0x1e5   : > { %v548_v23 = vld [vmem:[%s547_s30] sm:$0xf]  ;;  %980 = vmatprep.subr.bf16.mxu1 %v1334_v22  ;;  %982 = vmatprep.mubr.msk.bf16.mxu1 %vm1335_vm4, %v1334_v22  ;;  %s550_s6 = scalar_lea.vmem [#allocation4], %s1599_s28  ;;  %s660_s26 = scalar_lea.vmem [#allocation5], %s1599_s28  ;;  %vm1340_vm7 = vmmov (!%p933_p4), 0   ;;  %vm692_vm8 = vcmask (!%p933_p4), 130048  }
 0x1e6   : > { %v557_v24 = vsel %vm552_vm3, %v548_v23, 0  ;;  %v545_v25 = vld [vmem:[%s544_s18] sm:$0xf]  ;;  %s1336_s10 = smov (!%p933_p4), 8   ;;  %s1338_s12 = smov (!%p933_p4), 24   ;;  %vm695_vm9 = vcmask (!%p933_p4), 195584  }
 0x1e7   : > { %975 = vmatpush3.bf16.xpose.msra.mxu0 %v557_v24  ;;  %s1339_s16 = smov (!%p933_p4), 16   ;;  %vm721_vm10 = vcmask (!%p933_p4), 261120   ;;  %v937_v60 = vld [vmem:[%s1673_s4] ss:$0 sm:$0xff] (!%p933_p4) }
 0x1e8   : > { %986 = vmatprep.subr.bf16.mxu0 (!%p933_p4), %v1337_v50 }
 0x1e9   : > { %v551_v36 = vld [vmem:[%s550_s6] sm:$0xf] }
 0x1ea   : > { %v616_v37 = vsel %vm614_vm5, %v551_v36, 0 }
 0x1eb   : > { %981 = vmatpush3.bf16.msra.mxu1 %v616_v37 }
 0x1ee   : > { %977 = vmatmul.mubr.msk.bf16.vlgmr.msra.gmra.mrb[0].mxu0 %vm552_vm3, %v545_v25 }
 0x1ef   : > { %987 = vmatpush3.bf16.msra.mxu0 (!%p933_p4), %v1124_v51  ;;  %990 = vmatprep.mubr.msk.bf16.mxu0 (!%p933_p4), %vm1340_vm7, %v1337_v50 }
 0x1f0   : > { %988 = vmatprep.subr.bf16.mxu0 (!%p933_p4), %v1337_v50 }
 0x1f3   : > { %989 = vmatpush3.bf16.msra.mxu0 (!%p933_p4), %v1125_v52 }
 0x2c1   : > { %v593_v26 = vpop.f32.mrb[0].mxu0 }
 0x2c2   : > { %v978_v27 = vpop.f32.mrb[1].mxu0  ;;  %v599_v28 = vsel %vm552_vm3, %v593_v26, -inf }
 0x2c3   : > { %600 = vmax.xlane.f32.xlu0 %v599_v28  ;;  %v596_v29 = vpop.f32.mrb[2].mxu0 }
 0x2c4   : > { %v979_v30 = vpop.f32.mrb[3].mxu0 }
 0x350   : > { %v601_v31 = vpop.xlane.xlu0 %600 }
 0x351   : > { %v602_v32 = vsub.f32 %v593_v26, %v601_v31 }
 0x353   : > { %v603_v33 = vmul.f32 1.442695, %v602_v32 }
 0x355   : > { %1117 = vpow2.f32 %v603_v33 }
 0x35f   : > { %v1118_v34 = vpop.eup %1117 }
 0x360   : > { %v605_v35 = vsel %vm552_vm3, %v1118_v34, 0.0 }
 0x361   : > { %606 = vadd.xlane.f32.xlu0 %v605_v35 }
 0x3ee   : > { %v607_v38 = vpop.xlane.xlu0 %606 }
 0x3ef   : > { %1119 = vrcp.f32 %v607_v38 }
 0x3f9   : > { %v1120_v39 = vpop.eup %1119 }
 0x3fa   : > { %v609_v40 = vmul.f32 %v1120_v39, %v1118_v34 }
 0x3fc   : > { %v610_v41 = vpack.c.bf16 %v609_v40, %v609_v40 }
 0x3fe   : > { %983 = vmatmul.mubr.msk.bf16.vlgmr.msra.gmra.mrb[0].mxu1 %vm552_vm3, %v610_v41 }
 0x4ce   : > { %666 = sbr.rel (%p933_p4) target bundleno = 1580 (0x62c), region = 60 }
 0x4d1   : > { %v652_v42 = vpop.f32.mrb[0].mxu1 }
 0x4d2   : > { %v658_v43 = vpack.c.bf16 %v652_v42, %v652_v42  ;;  %v984_v44 = vpop.f32.mrb[1].mxu1 }
 0x4d3   : > { %v655_v45 = vpop.f32.mrb[2].mxu1 }
 0x4d4   : > { %662 = vst.msk [vmem:[%s660_s26] sm:$0xf] %vm661_vm6, %v658_v43  ;;  %v985_v46 = vpop.f32.mrb[3].mxu1 }
 0x4db   : > { %v1121_v47 = vld [vmem:[#allocation5 + $0x4] ss:$0 sps:$4 sm:$0xff]   ;;  %v1122_v48 = vld [vmem:[#allocation5 + $0x8] ss:$0 sps:$4 sm:$0xff]   ;;  %v1123_v49 = vld [vmem:[#allocation5 + $0xc] ss:$0 sps:$4 sm:$0xff]  }
 0x4dc   : > { %677 = vrot.lane.b32.xlu0 %v1121_v47, %s1336_s10  ;;  %687 = vrot.lane.b32.xlu1 %v1123_v49, %s1338_s12  ;;  %v667_v54 = vld [vmem:[#allocation5] sm:$0xf] }
 0x4e0   : > { %682 = vrot.lane.b32.xlu0 %v1122_v48, %s1339_s16 }
 0x54e   : > { %v678_v53 = vpop.permute.xlu0 %677  ;;  %v688_v55 = vpop.permute.xlu1 %687 }
 0x54f   : > { %v691_v56 = vsel %vm552_vm3, %v667_v54, %v678_v53 }
 0x552   : > { %v683_v57 = vpop.permute.xlu0 %682 }
 0x553   : > { %v694_v58 = vsel %vm692_vm8, %v691_v56, %v683_v57 }
 0x554   : > { %v697_v59 = vsel %vm695_vm9, %v694_v58, %v688_v55 }
 0x555   : > { %991 = vmatmul.mubr.msk.bf16.vlgmr.msra.gmra.mrb[0].mxu0 %vm721_vm10, %v697_v59 }
 0x628   : > { %v758_v61 = vpop.f32.mrb[0].mxu0 }
 0x629   : > { %v759_v62 = vadd.f32 %v937_v60, %v758_v61  ;;  %v992_v63 = vpop.f32.mrb[1].mxu0 }
 0x62a   : > { %v761_v0 = vpop.f32.mrb[2].mxu0 }
 0x62b   : > { %764 = vst.msk [vmem:[%s1580_s9] sm:$0xff] %vm721_vm10, %v759_v62  ;;  %v993_v1 = vpop.f32.mrb[3].mxu0 }
 0x62c PF: > { %s942_s27 = sshll.u32 %s1302_s22, 7  ;;  %s779_s28 = sshll.u32 %s1580_s9, 4  ;;  %s780_s28 = int_to_ptr.vmem [resolvable:$true] %s779_s28 }
 0x62d   : > { %s1620_s7 = scalar_lea.hbm %s1674_s5, %s942_s27  ;;  %s766_s30 = scalar_lea.sflag [#allocation8], %s1567_s11 }
 0x62e   : > { %s1212_s18 = scalar_lea.vmem %s780_s28, 128  ;;  %s1341_s6 = smov [#allocation12]  }
 0x62f   : > { %p1213_p10 = scmp.ne.s32.totalorder %s780_s28, %s1212_s18  ;;  %s1216_s26 = sshll.u32 %s1341_s6, 4  ;;  %s1217_s26 = int_to_ptr.vmem [resolvable:$false] %s1216_s26 }
 0x630   : > { %s1218_s10 = scalar_lea.vmem %s1217_s26, 256  ;;  %p1219_p3 = scmp.lt.s32.totalorder %s780_s28, %s1217_s26 }
 0x631   : > { %p1214_p8 = pnand %p1213_p10, %p1512_p6  ;;  %p1220_p7 = scmp.lt.s32.totalorder %s1218_s10, %s1212_s18 }
 0x633   : > { %p1215_p13 = pneg %p1214_p8  ;;  %p1221_p12 = por %p1220_p7, %p1219_p3 }
 0x635   : > { %p1222_p11 = pnand %p1221_p12, %p1215_p13 }
 0x637   : > { %1225 = shalt.err (!%p1222_p11)
}
 0x638   : > { %s1226_s22 = scalar_lea.hbm %s1620_s7, 128  ;;  %s1230_s12 = scalar_lea.hbm %s1674_s5, 256 }
 0x639   : > { %p1227_p1 = scmp.ne.s32.totalorder %s1620_s7, %s1226_s22  ;;  %p1231_p2 = scmp.lt.u32.totalorder %s1620_s7, %s1674_s5 }
 0x63a   : > { %p1232_p0 = scmp.lt.u32.totalorder %s1230_s12, %s1226_s22  ;;  %p1234_p10 = scmp.lt.u32.totalorder %s1226_s22, %s1620_s7 }
 0x63b   : > { %p1228_p9 = pnand %p1227_p1, %p1512_p6 }
 0x63c   : > { %p1233_p4 = por %p1232_p0, %p1231_p2 }
 0x63d   : > { %p1229_p5 = pneg %p1228_p9 }
 0x63e   : > { %p1235_p8 = por %p1234_p10, %p1233_p4 }
 0x640   : > { %p1236_p13 = pnand %p1235_p8, %p1229_p5 }
 0x642   : > { %1239 = shalt.err (!%p1236_p13)
}
 0x643   : > { %1004 = dma.vmem_to_hbm [thread:$0]  (%p1512_p6), %s780_s28, 128, %s1620_s7, %s766_s30  }
 0x644 PF: > { %s1698_s13 = sld [smem:[#allocation16_spill]]  ;;  %s1699_s27 = sld [smem:[#allocation17_spill]] }
 0x645   : > { %p1026_p3 = scmp.ge.s32.totalorder %s1314_s25, 2 }
 0x64a   : > { %s791_s8 = sand.u32 1, %s1698_s13   ;;  %p1700_p7 = scmp.ne.s32.totalorder %s1699_s27, 0 }
 0x64b   : > { %s792_s29 = scalar_lea.sflag [#allocation8], %s791_s8 }
 0x64c   : > { %p1018_p12 = pnand %p1026_p3, %p1700_p7 }
 0x64e   : > { %1281 = dma.done.wait (!%p1018_p12), %s792_s29, 128  }
 0x64f   : > { %1283 = vsyncadd (!%p1018_p12), %s792_s29, 4294967168  ;;  %s22_s25 = sadd.s32 1, %s1314_s25   ;;  %s1701_s18 = smov %s1290_s19 }
 0x650   : > { %p19_p11 = scmp.ge.s32.totalorder %s22_s25, 10   ;;  %s1702_s19 = smov %s1294_s20 }
 0x651   : > { %s1703_s20 = smov %s1535_s1  ;;  %s1704_s21 = smov %s1306_s23 }
 0x652   : > { %s1705_s22 = smov %s1310_s24  ;;  %s1706_s23 = smov %s1709_s14 }
 0x653   : > { %s1707_s24 = smov %s1713_s15  ;;  %21 = sbr.rel (!%p19_p11) target bundleno = 10 (0xa), region = 117 }
 0x65a   :  { %797 = vsyncpa [#allocation7], 1 }
 0x65b   :  { %799 = vsyncpa [#allocation7 + $0x1], 1 }
 0x65c   :  { %800 = vsyncpa [#allocation10], 1 }
 0x65d   :  { %801 = vsyncpa [#allocation8], 1 }
 0x65e   :  { %803 = vsyncpa [#allocation8 + $0x1], 1 }

</bundles_post_ra>
